<compile_context>
chip_gen: v7x
topology: tpu7x:2x2x1
jax: 0.10.0
libtpu: 0.0.40
codegen_flags: <defaults>
</compile_context>

<pallas_src>
import functools
import math

import jax
import jax.numpy as jnp
from jax.experimental import pallas as pl
from jax.experimental.pallas import tpu as pltpu


def _timestep_embedding_kernel(t_ref, fs_ref, w1_ref, b1_ref, w2_ref, b2_ref,
                               o_ref, emb_sc, *, mid: int):
    """One (split, K-tile) grid step.

    t_ref  : (B, 1)          f32  timesteps                       (resident)
    fs_ref : (1, dim)        f32  [freqs | freqs]                 (resident)
    w1_ref : (tk, dim)       bf16 row tile of W1 (nn.Linear (out,in) layout)
    b1_ref : (nk_total, tk)  f32  all b1 tiles                    (resident)
    w2_ref : (tk, dim)       bf16 row tile of W2^T ((in,out) layout)
    b2_ref : (1, dim)        f32                                   (resident)
    o_ref  : (B, dim)        f32  this split's partial output     (resident accumulator)
    emb_sc : (B, dim)        bf16 scratch: [cos | sin] embedding
    """
    c = pl.program_id(0)            # split index ("parallel" axis -> one per TensorCore)
    k = pl.program_id(1)            # K-tile index within the split ("arbitrary")
    nk = pl.num_programs(1)

    @pl.when(k == 0)
    def _init():
        # emb = [cos(t*f) | sin(t*f)] along lanes, built once per split.
        # (bf16 scratch matches the bf16-weight matmul numerics; use f32 scratch if
        #  tighter fidelity vs an f32 torch forward is required.)
        args = t_ref[...] * fs_ref[...]                              # (B, dim) outer product
        lane = jax.lax.broadcasted_iota(jnp.int32, args.shape, 1)
        emb = jnp.where(lane < mid, jnp.cos(args), jnp.sin(args))
        emb_sc[...] = emb.astype(emb_sc.dtype)
        # Partial accumulator: split 0 starts from b2, the other splits from zero.
        o_ref[...] = ((c == 0).astype(o_ref.dtype)
                      * jnp.broadcast_to(b2_ref[...], o_ref.shape))

    gk = c * nk + k                 # global hidden-tile index (selects the b1 row)

    # h = SiLU(emb @ W1[gk].T + b1[gk]) -- contraction on W1's minor (input) axis so the
    # streamed tile is a row-contiguous (tk, dim) slab.  MXU has huge slack at small B.
    h = jax.lax.dot_general(emb_sc[...], w1_ref[...],
                            dimension_numbers=(((1,), (1,)), ((), ())),
                            preferred_element_type=jnp.float32)       # (B, tk) f32
    h = h + b1_ref[pl.ds(gk, 1), :]
    h = h * jax.nn.sigmoid(h)                                         # SiLU in f32

    # partial += h @ W2[gk]
    o_ref[...] += jnp.dot(h.astype(w2_ref.dtype), w2_ref[...],
                          preferred_element_type=jnp.float32)


def prepare_params(w1, b1, w2, b2):
    """One-time dtype/layout prep (cache the result; do NOT re-run per forward step).

    Takes parameters in PyTorch nn.Linear layout:
      w1, w2: (out_features, in_features) = (dim, dim);  b1, b2: (dim,)
    """
    return dict(
        # (hidden, in): row tiles along hidden are contiguous DMAs.
        w1=jnp.asarray(w1).astype(jnp.bfloat16),
        b1=jnp.asarray(b1).astype(jnp.float32),
        # -> (hidden, out): row tiles along hidden are contiguous DMAs.
        w2=jnp.asarray(w2).astype(jnp.float32).T.astype(jnp.bfloat16),
        b2=jnp.asarray(b2).astype(jnp.float32).reshape(1, -1),
    )


def _weight_budget_bytes():
    """VMEM budget for double-buffered weight tiles (generation-aware, safe fallback)."""
    try:
        cap = int(pltpu.get_tpu_info().vmem_capacity_bytes)   # 128 MiB v5e/v6e, 64 MiB v7x
    except Exception:
        cap = 64 << 20
    return max(16 << 20, cap // 2 - (8 << 20))


def _pick_tk(dim, n_splits_target=2, budget_bytes=None):
    """Largest multiple-of-128 divisor of dim whose double-buffered bf16 W1+W2 tiles
    (8*dim*tk bytes) fit the budget, leaving >= n_splits_target K-tiles when possible."""
    if budget_bytes is None:
        budget_bytes = _weight_budget_bytes()
    max_tk = max(128, budget_bytes // (8 * dim))
    if dim >= n_splits_target * 128:
        max_tk = min(max_tk, dim // n_splits_target)
    tk = None
    for cand in range(128, dim + 1, 128):
        if dim % cand == 0 and cand <= max_tk:
            tk = cand
    return tk if tk is not None else dim        # fallback: one full tile


def timestep_embedding(timesteps, params, *, dim: int, max_period: int = 10000,
                       tk: int | None = None, n_splits: int | None = None):
    """timesteps: (B,) -> (B, dim) f32.  `params` comes from prepare_params()."""
    if dim % 2 != 0:
        raise ValueError(f"embedding dim must be even, got {dim}")
    B = int(timesteps.shape[0])
    mid = dim // 2

    w1, b1, w2, b2 = params["w1"], params["b1"], params["w2"], params["b2"]
    assert w1.shape == (dim, dim) and w2.shape == (dim, dim)

    if tk is None:
        tk = _pick_tk(dim)
    if dim % tk != 0:
        raise ValueError(f"tk={tk} must divide dim={dim}")
    nk_total = dim // tk
    if n_splits is None:
        n_splits = 2 if nk_total % 2 == 0 else 1    # use both TensorCores on v7x when possible
    if nk_total % n_splits != 0:
        raise ValueError(f"n_splits={n_splits} must divide dim//tk={nk_total}")
    nk = nk_total // n_splits                       # K-steps per split

    t2d = timesteps.astype(jnp.float32).reshape(B, 1)
    fs = jnp.exp((-math.log(max_period) / mid) * jnp.arange(mid, dtype=jnp.float32))
    fs_full = jnp.concatenate([fs, fs]).reshape(1, dim)   # lanes [0,mid)->cos, [mid,dim)->sin
    b1_tiles = b1.reshape(nk_total, tk)

    kernel = functools.partial(_timestep_embedding_kernel, mid=mid)

    # VMEM: double-buffered bf16 weight tiles dominate; everything else is resident/small.
    vmem_est = (8 * dim * tk                        # W1+W2 tiles, 2 buffers each, bf16
                + 2 * 8 * dim * 4 + dim * 4         # fs_full, b2 (sublane-padded), b1 tiles
                + max(B, 16) * dim * 2              # emb scratch (bf16)
                + 2 * max(B, 8) * dim * 4           # partial-output block (+ writeback buffer)
                + 8 * 128 * 4)                      # timesteps
    vmem_limit = int(min(max(vmem_est + (8 << 20), 32 << 20), 128 << 20))

    cost = pl.CostEstimate(
        flops=4 * B * dim * dim,                                   # two (B,dim)x(dim,dim) matmuls
        transcendentals=(2 * n_splits + 1) * B * dim,              # cos/sin per split + sigmoid
        bytes_accessed=(2 * dim * dim * 2                          # bf16 weights (the real traffic)
                        + 3 * dim * 4 + B * 4
                        + n_splits * B * dim * 4))

    partials = pl.pallas_call(
        kernel,
        out_shape=jax.ShapeDtypeStruct((n_splits, B, dim), jnp.float32),
        grid_spec=pltpu.PrefetchScalarGridSpec(
            num_scalar_prefetch=0,
            grid=(n_splits, nk),
            in_specs=[
                pl.BlockSpec((B, 1), lambda c, k: (0, 0)),                    # timesteps
                pl.BlockSpec((1, dim), lambda c, k: (0, 0)),                  # [freqs | freqs]
                pl.BlockSpec((tk, dim), lambda c, k: (c * nk + k, 0)),        # W1 row tile (contig)
                pl.BlockSpec((nk_total, tk), lambda c, k: (0, 0)),            # all b1 tiles (resident)
                pl.BlockSpec((tk, dim), lambda c, k: (c * nk + k, 0)),        # W2^T row tile (contig)
                pl.BlockSpec((1, dim), lambda c, k: (0, 0)),                  # b2
            ],
            out_specs=pl.BlockSpec((None, B, dim), lambda c, k: (c, 0, 0)),   # per-split partial
            scratch_shapes=[pltpu.VMEM((B, dim), jnp.bfloat16)],              # [cos|sin] embedding
        ),
        compiler_params=pltpu.CompilerParams(
            dimension_semantics=("parallel", "arbitrary"),
            vmem_limit_bytes=vmem_limit),
        cost_estimate=cost,
    )(t2d, fs_full, w1, b1_tiles, w2, b2)

    # Tiny cross-split reduce (b2 is already folded into split 0's partial).
    return partials.sum(axis=0)


def reference(timesteps, w1, b1, w2, b2, *, dim: int, max_period: int = 10000):
    """Pure-JAX mirror of the PyTorch forward (non-fourier, n_layers=2) with the same
    bf16-weight / f32-accumulate numerics as the kernel.  w1/w2 in nn.Linear (out, in)."""
    mid = dim // 2
    fs = jnp.exp(-math.log(max_period) / mid * jnp.arange(mid, dtype=jnp.float32))
    args = timesteps.astype(jnp.float32)[:, None] * fs[None]
    emb = jnp.concatenate([jnp.cos(args), jnp.sin(args)], axis=-1)
    h = jnp.dot(emb.astype(jnp.bfloat16), w1.T.astype(jnp.bfloat16),
                preferred_element_type=jnp.float32) + b1.astype(jnp.float32)
    h = h * jax.nn.sigmoid(h)
    return jnp.dot(h.astype(jnp.bfloat16), w2.T.astype(jnp.bfloat16),
                   preferred_element_type=jnp.float32) + b2.astype(jnp.float32)


if __name__ == "__main__":
    B = 8
    DIM = 512            # even, multiple of 128 -> lane-aligned streamed tiles
    MAX_PERIOD = 10000

    key = jax.random.PRNGKey(0)
    k_t, k_w1, k_b1, k_w2, k_b2 = jax.random.split(key, 5)

    bound = 1.0 / math.sqrt(DIM)
    timesteps = jax.random.uniform(k_t, (B,), jnp.float32, 0.0, 1000.0)
    # nn.Linear layout: weight (out_features, in_features), bias (out_features,)
    w1 = jax.random.uniform(k_w1, (DIM, DIM), jnp.float32, -bound, bound)
    b1 = jax.random.uniform(k_b1, (DIM,), jnp.float32, -bound, bound)
    w2 = jax.random.uniform(k_w2, (DIM, DIM), jnp.float32, -bound, bound)
    b2 = jax.random.uniform(k_b2, (DIM,), jnp.float32, -bound, bound)

    params = prepare_params(w1, b1, w2, b2)
    ref = reference(timesteps, w1, b1, w2, b2, dim=DIM, max_period=MAX_PERIOD)

    # Explicit small tile: grid = (2 splits, 2 K-steps) exercises both the cross-core
    # split and the in-split streamed-K accumulation.
    out = timestep_embedding(timesteps, params, dim=DIM, max_period=MAX_PERIOD, tk=128)
    out = jax.block_until_ready(out)
    assert out.shape == (B, DIM)
    err = float(jnp.max(jnp.abs(out - ref)))
    assert jnp.allclose(out, ref, atol=3e-2, rtol=3e-2), f"mismatch vs reference (max |err|={err})"

    # Default (VMEM-budget-derived) tile size.
    out2 = jax.block_until_ready(
        timestep_embedding(timesteps, params, dim=DIM, max_period=MAX_PERIOD))
    err2 = float(jnp.max(jnp.abs(out2 - ref)))
    assert jnp.allclose(out2, ref, atol=3e-2, rtol=3e-2), f"mismatch vs reference (max |err|={err2})"

    print("KERNEL_OK")
</pallas_src>

<mosaic_0001>
module attributes {stable_mosaic.version = 11 : i64} {
  func.func @_timestep_embedding_kernel(%arg0: i32, %arg1: i32, %arg2: memref<8x1xf32, #tpu.memory_space<vmem>>, %arg3: memref<1x512xf32, #tpu.memory_space<vmem>>, %arg4: memref<128x512xbf16, #tpu.memory_space<vmem>>, %arg5: memref<4x128xf32, #tpu.memory_space<vmem>>, %arg6: memref<128x512xbf16, #tpu.memory_space<vmem>>, %arg7: memref<1x512xf32, #tpu.memory_space<vmem>>, %arg8: memref<1x8x512xf32, #tpu.memory_space<vmem>>, %arg9: memref<8x512xbf16, #tpu.memory_space<vmem>>) attributes {dimension_semantics = [#tpu.dimension_semantics<parallel>, #tpu.dimension_semantics<arbitrary>], iteration_bounds = array<i64: 2, 2>, scalar_prefetch = 0 : i64, scratch_operands = 1 : i64, tpu.core_type = #tpu.core_type<tc>, window_params = [{pipeline_mode = #tpu.pipeline_mode<synchronous>, transform_indices = @transform_0, window_bounds = array<i64: 8, 1>}, {pipeline_mode = #tpu.pipeline_mode<synchronous>, transform_indices = @transform_1, window_bounds = array<i64: 1, 512>}, {transform_indices = @transform_2, window_bounds = array<i64: 128, 512>}, {pipeline_mode = #tpu.pipeline_mode<synchronous>, transform_indices = @transform_3, window_bounds = array<i64: 4, 128>}, {transform_indices = @transform_4, window_bounds = array<i64: 128, 512>}, {pipeline_mode = #tpu.pipeline_mode<synchronous>, transform_indices = @transform_5, window_bounds = array<i64: 1, 512>}, {transform_indices = @transform_6, window_bounds = array<i64: 1, 8, 512>}]} {
    %c0_i32 = arith.constant 0 : i32
    %0 = arith.cmpi eq, %arg1, %c0_i32 : i32
    %1 = arith.extui %0 : i1 to i32
    %c0_i32_0 = arith.constant 0 : i32
    %2 = arith.cmpi ne, %1, %c0_i32_0 : i32
    scf.if %2 {
      %c0_15 = arith.constant 0 : index
      %c0_16 = arith.constant 0 : index
      %27 = vector.load %arg2[%c0_15, %c0_16] : memref<8x1xf32, #tpu.memory_space<vmem>>, vector<8x1xf32>
      %c0_17 = arith.constant 0 : index
      %c0_18 = arith.constant 0 : index
      %28 = vector.load %arg3[%c0_17, %c0_18] : memref<1x512xf32, #tpu.memory_space<vmem>>, vector<1x512xf32>
      %29 = vector.broadcast %27 : vector<8x1xf32> to vector<8x512xf32>
      %30 = vector.broadcast %28 : vector<1x512xf32> to vector<8x512xf32>
      %31 = arith.mulf %29, %30 : vector<8x512xf32>
      %32 = tpu.iota {dimensions = array<i32: 1>} : vector<8x512xi32>
      %c256_i32 = arith.constant 256 : i32
      %33 = vector.broadcast %c256_i32 : i32 to vector<8x512xi32>
      %34 = arith.cmpi slt, %32, %33 : vector<8x512xi32>
      %35 = math.cos %31 : vector<8x512xf32>
      %36 = math.sin %31 : vector<8x512xf32>
      %37 = arith.select %34, %35, %36 : vector<8x512xi1>, vector<8x512xf32>
      %38 = arith.truncf %37 : vector<8x512xf32> to vector<8x512xbf16>
      %c0_19 = arith.constant 0 : index
      %c0_20 = arith.constant 0 : index
      %39 = vector.load %arg9[%c0_19, %c0_20] : memref<8x512xbf16, #tpu.memory_space<vmem>>, vector<8x512xbf16>
      tpu.vector_store %arg9[%c0_19, %c0_20], %38 {strides = array<i32>} : memref<8x512xbf16, #tpu.memory_space<vmem>>, vector<8x512xbf16>,
      %c0_i32_21 = arith.constant 0 : i32
      %40 = arith.cmpi eq, %arg0, %c0_i32_21 : i32
      %41 = arith.extui %40 : i1 to i32
      %42 = arith.sitofp %41 : i32 to f32
      %c0_22 = arith.constant 0 : index
      %c0_23 = arith.constant 0 : index
      %43 = vector.load %arg7[%c0_22, %c0_23] : memref<1x512xf32, #tpu.memory_space<vmem>>, vector<1x512xf32>
      %44 = vector.shape_cast %43 : vector<1x512xf32> to vector<1x512xf32>
      %45 = vector.broadcast %44 : vector<1x512xf32> to vector<8x512xf32>
      %46 = vector.broadcast %42 : f32 to vector<8x512xf32>
      %47 = arith.mulf %46, %45 : vector<8x512xf32>
      %c0_24 = arith.constant 0 : index
      %c0_25 = arith.constant 0 : index
      %c0_26 = arith.constant 0 : index
      %48 = vector.load %arg8[%c0_24, %c0_25, %c0_26] : memref<1x8x512xf32, #tpu.memory_space<vmem>>, vector<1x8x512xf32>
      %49 = vector.shape_cast %48 : vector<1x8x512xf32> to vector<8x512xf32>
      %50 = vector.shape_cast %47 : vector<8x512xf32> to vector<1x8x512xf32>
      tpu.vector_store %arg8[%c0_24, %c0_25, %c0_26], %50 {strides = array<i32>} : memref<1x8x512xf32, #tpu.memory_space<vmem>>, vector<1x8x512xf32>,
    } else {
    }
    %c2_i32 = arith.constant 2 : i32
    %3 = arith.muli %arg0, %c2_i32 : i32
    %4 = arith.addi %3, %arg1 : i32
    %c0 = arith.constant 0 : index
    %c0_1 = arith.constant 0 : index
    %5 = vector.load %arg9[%c0, %c0_1] : memref<8x512xbf16, #tpu.memory_space<vmem>>, vector<8x512xbf16>
    %c0_2 = arith.constant 0 : index
    %c0_3 = arith.constant 0 : index
    %6 = vector.load %arg4[%c0_2, %c0_3] : memref<128x512xbf16, #tpu.memory_space<vmem>>, vector<128x512xbf16>
    %cst = arith.constant dense<0.000000e+00> : vector<8x128xf32>
    %7 = tpu.matmul %5, %6, %cst {dimension_numbers = #tpu.dot_dimension_numbers<[1], [1], [0], [0], [0, 0, 1, 0], [], []>} : vector<8x512xbf16>, vector<128x512xbf16>, vector<8x128xf32> -> vector<8x128xf32>
    %8 = arith.index_cast %4 : i32 to index
    %c0_4 = arith.constant 0 : index
    %9 = vector.load %arg5[%8, %c0_4] : memref<4x128xf32, #tpu.memory_space<vmem>>, vector<1x128xf32>
    %10 = vector.broadcast %9 : vector<1x128xf32> to vector<8x128xf32>
    %11 = arith.addf %7, %10 : vector<8x128xf32>
    %12 = arith.negf %11 : vector<8x128xf32>
    %13 = math.exp %12 : vector<8x128xf32>
    %cst_5 = arith.constant 1.000000e+00 : f32
    %14 = vector.broadcast %cst_5 : f32 to vector<8x128xf32>
    %15 = arith.addf %14, %13 : vector<8x128xf32>
    %16 = arith.divf %14, %15 : vector<8x128xf32>
    %17 = arith.mulf %11, %16 : vector<8x128xf32>
    %c0_6 = arith.constant 0 : index
    %c0_7 = arith.constant 0 : index
    %c0_8 = arith.constant 0 : index
    %18 = vector.load %arg8[%c0_6, %c0_7, %c0_8] : memref<1x8x512xf32, #tpu.memory_space<vmem>>, vector<1x8x512xf32>
    %19 = vector.shape_cast %18 : vector<1x8x512xf32> to vector<8x512xf32>
    %20 = arith.truncf %17 : vector<8x128xf32> to vector<8x128xbf16>
    %c0_9 = arith.constant 0 : index
    %c0_10 = arith.constant 0 : index
    %21 = vector.load %arg6[%c0_9, %c0_10] : memref<128x512xbf16, #tpu.memory_space<vmem>>, vector<128x512xbf16>
    %cst_11 = arith.constant dense<0.000000e+00> : vector<8x512xf32>
    %22 = tpu.matmul %20, %21, %cst_11 {dimension_numbers = #tpu.dot_dimension_numbers<[1], [0], [0], [1], [0, 0, 1, 1], [], []>} : vector<8x128xbf16>, vector<128x512xbf16>, vector<8x512xf32> -> vector<8x512xf32>
    %23 = arith.addf %19, %22 : vector<8x512xf32>
    %c0_12 = arith.constant 0 : index
    %c0_13 = arith.constant 0 : index
    %c0_14 = arith.constant 0 : index
    %24 = vector.load %arg8[%c0_12, %c0_13, %c0_14] : memref<1x8x512xf32, #tpu.memory_space<vmem>>, vector<1x8x512xf32>
    %25 = vector.shape_cast %24 : vector<1x8x512xf32> to vector<8x512xf32>
    %26 = vector.shape_cast %23 : vector<8x512xf32> to vector<1x8x512xf32>
    tpu.vector_store %arg8[%c0_12, %c0_13, %c0_14], %26 {strides = array<i32>} : memref<1x8x512xf32, #tpu.memory_space<vmem>>, vector<1x8x512xf32>,
    return
  }
  func.func @transform_0(%arg0: i32, %arg1: i32) -> (i32, i32) {
    %c0_i32 = arith.constant 0 : i32
    %c0_i32_0 = arith.constant 0 : i32
    %c0_i32_1 = arith.constant 0 : i32
    return %c0_i32, %c0_i32_0 : i32, i32
  }
  func.func @transform_1(%arg0: i32, %arg1: i32) -> (i32, i32) {
    %c0_i32 = arith.constant 0 : i32
    %c0_i32_0 = arith.constant 0 : i32
    %c0_i32_1 = arith.constant 0 : i32
    return %c0_i32, %c0_i32_0 : i32, i32
  }
  func.func @transform_2(%arg0: i32, %arg1: i32) -> (i32, i32) {
    %c2_i32 = arith.constant 2 : i32
    %0 = arith.muli %arg0, %c2_i32 : i32
    %1 = arith.addi %0, %arg1 : i32
    %c0_i32 = arith.constant 0 : i32
    %c0_i32_0 = arith.constant 0 : i32
    return %1, %c0_i32 : i32, i32
  }
  func.func @transform_3(%arg0: i32, %arg1: i32) -> (i32, i32) {
    %c0_i32 = arith.constant 0 : i32
    %c0_i32_0 = arith.constant 0 : i32
    %c0_i32_1 = arith.constant 0 : i32
    return %c0_i32, %c0_i32_0 : i32, i32
  }
  func.func @transform_4(%arg0: i32, %arg1: i32) -> (i32, i32) {
    %c2_i32 = arith.constant 2 : i32
    %0 = arith.muli %arg0, %c2_i32 : i32
    %1 = arith.addi %0, %arg1 : i32
    %c0_i32 = arith.constant 0 : i32
    %c0_i32_0 = arith.constant 0 : i32
    return %1, %c0_i32 : i32, i32
  }
  func.func @transform_5(%arg0: i32, %arg1: i32) -> (i32, i32) {
    %c0_i32 = arith.constant 0 : i32
    %c0_i32_0 = arith.constant 0 : i32
    %c0_i32_1 = arith.constant 0 : i32
    return %c0_i32, %c0_i32_0 : i32, i32
  }
  func.func @transform_6(%arg0: i32, %arg1: i32) -> (i32, i32, i32) {
    %c0_i32 = arith.constant 0 : i32
    %c0_i32_0 = arith.constant 0 : i32
    %c0_i32_1 = arith.constant 0 : i32
    return %arg0, %c0_i32, %c0_i32_0 : i32, i32, i32
  }
}

</mosaic_0001>

<bundles_post_ra>
// kernel: tpu_custom_call.1
= control target key start
LH: loop header
LB: loop body
LE: loop exit
PB: predicated region body
PF: predicated region fallthrough
CT: control target
= control target key end

     0   :  { %s3339_s0 = inlined_call_operand.vmem [shape: f32[8,1], index: 0, kind: input, shape index: {}]   ;;  %s3340_s1 = inlined_call_operand.vmem [shape: f32[1,512], index: 1, kind: input, shape index: {}]   ;;  %s3341_s2 = inlined_call_operand.hbm [shape: bf16[512,512], index: 2, kind: input, shape index: {}]   ;;  %s3342_s3 = inlined_call_operand.vmem [shape: f32[4,128], index: 3, kind: input, shape index: {}]   ;;  %s3343_s4 = inlined_call_operand.hbm [shape: bf16[512,512], index: 4, kind: input, shape index: {}]   ;;  %s3344_s5 = inlined_call_operand.vmem [shape: f32[1,512], index: 5, kind: input, shape index: {}]   ;;  %s3345_s6 = inlined_call_operand.hbm [shape: f32[2,8,512], index: 6, kind: output, shape index: {}]  }
   0x1   :  { %3356 = sst [smem:[#allocation19_spill]] %s3341_s2 }
   0x2   :  { %3357 = sst [smem:[#allocation20_spill]] %s3345_s6 }
   0x3   :  { %11 = vsyncpa [#allocation4], 0 }
   0x4   :  { %13 = vsyncpa [#allocation4 + $0x1], 0 }
   0x5   :  { %14 = vsyncpa [#allocation7], 0 }
   0x6   :  { %16 = vsyncpa [#allocation7 + $0x1], 0 }
   0x7   :  { %17 = vsyncpa [#allocation5], 0 }
   0x8   :  { %19 = vsyncpa [#allocation5 + $0x1], 0  ;;  %s2623_s21 = smov 0   ;;  %s2625_s22 = smov 0  }
   0x9   :  { %s2627_s23 = smov 0   ;;  %s2629_s24 = smov 0  }
   0xa   :  { %s2631_s25 = smov 0   ;;  %s2633_s26 = smov 0  }
   0xb   :  { %s2635_s27 = smov 0   ;;  %s2637_s28 = smov 0  }
   0xc   :  { %s2639_s29 = smov 0   ;;  %s2641_s30 = smov 0  }
   0xd   :  { %s2643_s7 = smov 0  }
   0xe LB: > { %3358 = sst [smem:[#allocation12_spill]] %s2553_s26  ;;  %s1988_s8 = sadd.s32 4294967295, %s2573_s7   ;;  %s2573_s7 = sphi %s2643_s7, %s25_s7   ;;  %s2569_s30 = sphi %s2641_s30, %s3392_s30   ;;  %s2565_s29 = sphi %s2639_s29, %s3399_s29   ;;  %s2561_s28 = sphi %s2637_s28, %s3390_s28   ;;  %s2557_s27 = sphi %s2635_s27, %s3398_s27   ;;  %s2553_s26 = sphi %s2633_s26, %s3388_s26   ;;  %s2549_s25 = sphi %s2631_s25, %s3397_s25   ;;  %s2545_s24 = sphi %s2629_s24, %s3396_s24   ;;  %s2541_s23 = sphi %s2627_s23, %s3395_s23   ;;  %s2537_s22 = sphi %s2625_s22, %s3394_s22   ;;  %s2533_s21 = sphi %s2623_s21, %s3393_s21  }
   0xf   : > { %3359 = sst [smem:[#allocation13_spill]] %s2565_s29  ;;  %s34_s10 = sadd.s32 1, %s2565_s29 }
  0x10   : > { %3360 = sst [smem:[#allocation14_spill]] %s2569_s30  ;;  %s37_s11 = sadd.s32 1, %s2569_s30 }
  0x11   : > { %p35_p0 = scmp.ge.s32.totalorder %s34_s10, 2  ;;  %s1990_s12 = sshll.u32 %s2569_s30, 1 }
  0x12   : > { %s2682_s13 = sadd.s32 %s2565_s29, %s1990_s12  ;;  %s90_s14 = sadd.s32 1, %s2553_s26 }
  0x13   : > { %s3401_s10 = smov (%p35_p0, %s34_s10), 0  ;;  %s3403_s11 = smov (!%p35_p0, %s37_s11), %s2569_s30 }
  0x14   : > { %3361 = sst [smem:[#allocation15_spill]] %s3401_s10  ;;  %p97_p1 = scmp.ne.s32.totalorder %s2553_s26, %s2549_s25 }
  0x15   : > { %p98_p2 = scmp.eq.s32.totalorder %s2573_s7, 0  ;;  %p39_p3 = scmp.ge.s32.totalorder %s3403_s11, 2 }
  0x16   : > { %p103_p4 = scmp.ne.s32.totalorder %s2549_s25, %s2545_s24  ;;  %p104_p6 = scmp.eq.s32.totalorder %s1988_s8, 0 }
  0x17   : > { %p2692_p5 = por %p98_p2, %p97_p1  ;;  %s3405_s11 = smov (%p39_p3, %s3403_s11), 0 }
  0x18   : > { %3363 = sst [smem:[#allocation16_spill]] %s3405_s11  ;;  %p2698_p7 = por %p104_p6, %p103_p4 }
  0x19   : > { %s188_s17 = sadd.s32 1, %s2541_s23  ;;  %s1991_s18 = sshll.u32 %s3405_s11, 1 }
  0x1a   : > { %s3364_s16 = scalar_select %p2698_p7, 1, 0 }
  0x1b   : > { %s185_s19 = ssub.s32 %s2569_s30, %s3405_s11  ;;  %s86_s20 = sadd.s32 %s1991_s18, %s3401_s10 }
  0x1c   : > { %p186_p8 = scmp.eq.s32.totalorder %s185_s19, 0  ;;  %s87_s24 = ssub.s32 %s2682_s13, %s86_s20 }
  0x1d   : > { %p198_p9 = scmp.ne.s32.totalorder %s2541_s23, %s2537_s22  ;;  %p88_p10 = scmp.eq.s32.totalorder %s87_s24, 0 }
  0x1e   : > { %p199_p11 = scmp.eq.s32.totalorder %s1988_s8, 3  ;;  %p204_p13 = scmp.ne.s32.totalorder %s2537_s22, %s2533_s21 }
  0x1f   : > { %s2711_s12 = scalar_select %p186_p8, %s2541_s23, %s188_s17  }
  0x20   : > { %s2714_s9 = scalar_select %p88_p10, %s2553_s26, %s90_s14  }
  0x21   : > { %3365 = sst [smem:[#allocation17_spill]] %s2711_s12  ;;  %p2716_p12 = por %p199_p11, %p198_p9 }
  0x22   : > { %3366 = sst [smem:[#allocation18_spill]] %s2714_s9  ;;  %s3368_s6 = sadd.s32 4294967294, %s2573_s7  }
  0x23   : > { %s3367_s29 = scalar_select %p2716_p12, 1, 0 }
  0x24   : > { %p205_p0 = scmp.eq.s32.totalorder %s3368_s6, 3  ;;  %p2166_p1 = scmp.lt.s32.totalorder %s2573_s7, 4 }
  0x25   : > { %s2726_s18 = sand.u32 1, %s2553_s26   ;;  %s3352_s14 = sshll.u32 %s2682_s13, 12 }
  0x26   : > { %p2728_p2 = por %p205_p0, %p204_p13  ;;  %s3351_s8 = sshll.u32 %s2726_s18, 8 }
  0x27   : > { %s3370_s2 = sld [smem:[#allocation19_spill]]  ;;  %s241_s6 = scalar_lea.vmem [#allocation3], %s3351_s8 }
  0x28   : > { %s3369_s19 = scalar_select %p2728_p2, 1, 0 }
  0x29   : > { %s251_s11 = sshll.u32 %s241_s6, 4  ;;  %p2745_p3 = pnand %p2166_p1, %p2692_p5  ;;  %s2749_s11 = int_to_ptr.vmem [resolvable:$true] %s251_s11 }
  0x2b   : > { %p2389_p6 = pneg %p2745_p3 }
  0x2d   : > { %s2739_s24 = scalar_lea.hbm %s3370_s2, %s3352_s14  ;;  %s2392_s15 = scalar_lea.hbm %s3370_s2, 16384 }
  0x2e   : > { %s2387_s17 = scalar_lea.hbm %s2739_s24, 4096  ;;  %p2393_p5 = scmp.lt.u32.totalorder %s2739_s24, %s3370_s2 }
  0x2f   : > { %p2388_p4 = scmp.ne.s32.totalorder %s2739_s24, %s2387_s17  ;;  %p2394_p10 = scmp.lt.u32.totalorder %s2392_s15, %s2387_s17 }
  0x30   : > { %p2396_p13 = scmp.lt.u32.totalorder %s2387_s17, %s2739_s24 }
  0x31   : > { %p2390_p8 = pnand %p2389_p6, %p2388_p4  ;;  %p2395_p11 = por %p2394_p10, %p2393_p5 }
  0x33   : > { %p2391_p9 = pneg %p2390_p8  ;;  %p2397_p0 = por %p2396_p13, %p2395_p11 }
  0x35   : > { %p2398_p1 = pnand %p2397_p0, %p2391_p9 }
  0x37   : > { %2401 = shalt.err (!%p2398_p1)
}
  0x38   : > { %s2402_s30 = scalar_lea.vmem %s2749_s11, 4096  ;;  %s2575_s20 = smov [#allocation3]  }
  0x39   : > { %p2403_p4 = scmp.ne.s32.totalorder %s2749_s11, %s2402_s30  ;;  %s2407_s6 = sshll.u32 %s2575_s20, 4  ;;  %s2408_s6 = int_to_ptr.vmem [resolvable:$false] %s2407_s6 }
  0x3a   : > { %s2409_s8 = scalar_lea.vmem %s2408_s6, 8192  ;;  %p2410_p12 = scmp.lt.s32.totalorder %s2749_s11, %s2408_s6 }
  0x3b   : > { %p2405_p8 = pnand %p2403_p4, %p2389_p6  ;;  %p2411_p5 = scmp.lt.s32.totalorder %s2409_s8, %s2402_s30 }
  0x3d   : > { %p2406_p2 = pneg %p2405_p8  ;;  %p2412_p10 = por %p2411_p5, %p2410_p12 }
  0x3f   : > { %p2413_p11 = pnand %p2412_p10, %p2406_p2 }
  0x41   : > { %2416 = shalt.err (!%p2413_p11)
}
  0x42   : > { %s2576_s14 = smov 256   ;;  %s2577_s17 = smov 16  }
  0x43   : > { %s3372_s30 = scalar_lea.sflag [#allocation4], %s2726_s18  ;;  %p2006_p12 = scmp.ge.s32.totalorder %s2573_s7, 1 }
  0x44   : > { %2158 = dma.hbm_to_vmem [thread:$0]  (!%p2745_p3), %s2739_s24, 4096, %s2749_s11, %s3372_s30, %s2576_s14, %s2576_s14, %s2577_s17  }
  0x45   : > { %p283_p2 = scmp.lt.s32.totalorder %s2573_s7, 5  ;;  %s3374_s20 = sshll.u32 %s2682_s13, 12 }
  0x46   : > { %s2793_s2 = scalar_lea.hbm %s3343_s4, %s3374_s20  ;;  %s3375_s9 = sshll.u32 %s2726_s18, 8 }
  0x47   : > { %p2784_p9 = pnand %p2006_p12, %p283_p2  ;;  %s265_s26 = scalar_lea.vmem [#allocation6], %s3375_s9 }
  0x48   : > { %s275_s12 = sshll.u32 %s265_s26, 4  ;;  %s262_s11 = scalar_lea.sflag [#allocation7], %s2726_s18  ;;  %s2797_s12 = int_to_ptr.vmem [resolvable:$true] %s275_s12 }
  0x49   : > { %s2417_s24 = scalar_lea.hbm %s2793_s2, 4096  ;;  %s2422_s20 = scalar_lea.hbm %s3343_s4, 16384 }
  0x4a   : > { %p2418_p13 = scmp.ne.s32.totalorder %s2793_s2, %s2417_s24  ;;  %p2423_p4 = scmp.lt.u32.totalorder %s2793_s2, %s3343_s4 }
  0x4b   : > { %p2424_p8 = scmp.lt.u32.totalorder %s2422_s20, %s2417_s24  ;;  %p2426_p10 = scmp.lt.u32.totalorder %s2417_s24, %s2793_s2 }
  0x4c   : > { %p2420_p0 = pnand %p2418_p13, %p2389_p6 }
  0x4d   : > { %p2425_p5 = por %p2424_p8, %p2423_p4 }
  0x4e   : > { %p2421_p1 = pneg %p2420_p0 }
  0x4f   : > { %p2427_p11 = por %p2426_p10, %p2425_p5 }
  0x51   : > { %p2428_p12 = pnand %p2427_p11, %p2421_p1 }
  0x53   : > { %2431 = shalt.err (!%p2428_p12)
}
  0x54   : > { %s2432_s26 = scalar_lea.vmem %s2797_s12, 4096  ;;  %s2578_s9 = smov [#allocation6]  }
  0x55   : > { %p2433_p2 = scmp.ne.s32.totalorder %s2797_s12, %s2432_s26  ;;  %s2437_s13 = sshll.u32 %s2578_s9, 4  ;;  %s2438_s13 = int_to_ptr.vmem [resolvable:$false] %s2437_s13 }
  0x56   : > { %s2439_s30 = scalar_lea.vmem %s2438_s13, 8192  ;;  %p2440_p7 = scmp.lt.s32.totalorder %s2797_s12, %s2438_s13 }
  0x57   : > { %p2435_p13 = pnand %p2433_p2, %p2389_p6  ;;  %p2441_p4 = scmp.lt.s32.totalorder %s2439_s30, %s2432_s26 }
  0x59   : > { %p2436_p0 = pneg %p2435_p13  ;;  %p2442_p8 = por %p2441_p4, %p2440_p7 }
  0x5b   : > { %p2443_p5 = pnand %p2442_p8, %p2436_p0 }
  0x5d   : > { %2446 = shalt.err (!%p2443_p5)
}
  0x5e   : > { %2161 = dma.hbm_to_vmem [thread:$0]  (!%p2745_p3), %s2793_s2, 4096, %s2797_s12, %s262_s11, %s2576_s14, %s2576_s14, %s2577_s17  }
  0x5f   : > { %287 = sbr.rel (%p2784_p9) target bundleno = 1011 (0x3f3), region = 44  ;;  %s289_s24 = sand.u32 (!%p2784_p9), 1, %s2549_s25  }
  0x60   : > { %s2007_s20 = sshll.u32 (!%p2784_p9), %s289_s24, 8  ;;  %s290_s6 = scalar_lea.sflag (!%p2784_p9), [#allocation4], %s289_s24 }
  0x61   : > { %s2831_s8 = scalar_lea.vmem (!%p2784_p9), [#allocation3], %s2007_s20  ;;  %p3376_p7 = scmp.ne.s32.totalorder (!%p2784_p9), %s3364_s16, 0 }
  0x66   : > { %2520 = dma.done.wait (%p3376_p7), %s290_s6, 4096  }
  0x67   : > { %2522 = vsyncadd (%p3376_p7), %s290_s6, 4294963200  ;;  %s299_s10 = scalar_lea.sflag [#allocation7], %s289_s24  ;;  %s2837_s18 = scalar_lea.vmem [#allocation6], %s2007_s20 }
  0x68   : > { %2524 = dma.done.wait (%p3376_p7), %s299_s10, 4096  }
  0x69   : > { %2526 = vsyncadd (%p3376_p7), %s299_s10, 4294963200  ;;  %s333_s2 = sand.u32 1, %s2537_s22   ;;  %p2010_p3 = scmp.ne.s32.totalorder %s2557_s27, 0 }
  0x6a   : > { %s2009_s12 = sshll.u32 %s333_s2, 5  ;;  %v347_v0 = vld [vmem:[%s3339_s0] sm:$0xff] (!%p2010_p3)  ;;  %v2579_v1 = vmov (!%p2010_p3), 0   ;;  %v355_v2 = vlaneseq (!%p2010_p3)  ;;  %v2580_v43 = vmov (!%p2010_p3), 683565275   ;;  %p1238_p6 = scmp.eq.s32.totalorder (!%p2010_p3), %s2561_s28, 0 }
  0x6b   : > { %s2846_s14 = scalar_lea.vmem [#allocation8], %s2009_s12  ;;  %346 = sbr.rel (%p2010_p3) target bundleno = 377 (0x179), region = 56  ;;  %2266 = vset.pattern.permute.xlu0 (!%p2010_p3), %v2579_v1  ;;  %v348_v6 = vld [vmem:[%s3340_s1] sm:$0xf] (!%p2010_p3)  ;;  %v2581_v47 = vmov (!%p2010_p3), 2475754826  }
  0x6c   : > { %351 = vperm.xlu0 (!%p2010_p3), %2266, %v347_v0   ;;  %v2852_v3 = vshrl.u32 (!%p2010_p3), %v355_v2, 7  ;;  %v2582_v49 = vmov (!%p2010_p3), 2131351028   ;;  %v2583_v51 = vmov (!%p2010_p3), 2102212464  }
  0x6d   : > { %v2584_v53 = vmov (!%p2010_p3), 920167782   ;;  %v2585_v60 = vmov (!%p2010_p3), 1326507024  }
  0x6e   : > { %v357_v4 = vsub.s32 (!%p2010_p3), 0, %v2852_v3  ;;  %v361_v5 = vsub.s32 (!%p2010_p3), 1, %v2852_v3  ;;  %v365_v7 = vsub.s32 (!%p2010_p3), 2, %v2852_v3  ;;  %v369_v24 = vsub.s32 (!%p2010_p3), 3, %v2852_v3 }
  0x70   : > { %v358_v8 = vrot.slane (!%p2010_p3), %v348_v6, %v357_v4  ;;  %v362_v9 = vrot.slane (!%p2010_p3), %v348_v6, %v361_v5  ;;  %v366_v10 = vrot.slane (!%p2010_p3), %v348_v6, %v365_v7  ;;  %v2889_v33 = vrot.slane (!%p2010_p3), %v348_v6, %v369_v24 }
  0x72   : > { %s3097_s26 = scalar_select %p1238_p6, 1, 0 }
  0x74   : > { %s1240_s30 = scvt.s32.f32 %s3097_s26 }
  0xeb   : > { %v2866_v11 = vpop.permute.xlu0 %351 }
  0xec   : > { %v2869_v12 = vmul.f32 %v358_v8, %v2866_v11  ;;  %v2872_v13 = vmul.f32 %v362_v9, %v2866_v11  ;;  %v2875_v14 = vmul.f32 %v366_v10, %v2866_v11 }
  0xee   : > { %v388_v15 = vand.u32 2147483647, %v2869_v12  ;;  %v391_v16 = vand.u32 2139095040, %v2869_v12  ;;  %v491_v17 = vand.u32 2147483647, %v2872_v13  ;;  %v494_v18 = vand.u32 2139095040, %v2872_v13 }
  0xef   : > { %v1011_v23 = vand.u32 2139095040, %v2875_v14  ;;  %v1008_v40 = vand.u32 2147483647, %v2875_v14 }
  0xf0   : > { %v392_v19 = vshrl.u32 %v391_v16, 23  ;;  %v395_v20 = vand.u32 8388607, %v388_v15  ;;  %v495_v21 = vshrl.u32 %v494_v18, 23  ;;  %v498_v22 = vand.u32 8388607, %v491_v17 }
  0xf1   : > { %v1012_v27 = vshrl.u32 %v1011_v23, 23 }
  0xf2   : > { %v2011_v25 = vadd.s32 4294967169, %v392_v19  ;;  %v2015_v26 = vadd.s32 4294967169, %v495_v21  ;;  %v396_v29 = vor.u32 8388608, %v395_v20  ;;  %v499_v30 = vor.u32 8388608, %v498_v22 }
  0xf3   : > { %v2035_v32 = vadd.s32 4294967169, %v1012_v27 }
  0xf4   : > { %v398_v28 = vadd.s32 1, %v2011_v25  ;;  %v501_v31 = vadd.s32 1, %v2015_v26  ;;  %v2891_v38 = vshll.u32 %v396_v29, 8  ;;  %v2893_v39 = vshll.u32 %v499_v30, 8 }
  0xf5   : > { %v2896_v41 = vadd.s32 1, %v2035_v32 }
  0xf6   : > { %vm399_vm0 = vcmp.gt.s32.totalorder %v398_v28, 0  ;;  %vm502_vm1 = vcmp.gt.s32.totalorder %v501_v31, 0 }
  0xf7   : > { %v400_v34 = vsel %vm399_vm0, %v398_v28, 0  ;;  %v503_v37 = vsel %vm502_vm1, %v501_v31, 0  ;;  %vm1019_vm6 = vcmp.gt.s32.totalorder %v2896_v41, 0  ;;  %vm390_vm1 = vcmp.lt.s32.totalorder %v2869_v12, 0 }
  0xf8   : > { %v401_v35 = vshrl.u32 %v400_v34, 5  ;;  %v402_v36 = vand.u32 31, %v400_v34  ;;  %v2899_v45 = vshrl.u32 %v503_v37, 5  ;;  %v505_v46 = vand.u32 31, %v503_v37 }
  0xfa   : > { %v403_v42 = vsub.s32 32, %v402_v36  ;;  %v405_v44 = vshll.u32 %v2580_v43, %v402_v36  ;;  %v408_v48 = vshll.u32 %v2581_v47, %v402_v36  ;;  %v411_v50 = vshll.u32 %v2582_v49, %v402_v36 }
  0xfb   : > { %v414_v52 = vshll.u32 %v2583_v51, %v402_v36  ;;  %v417_v54 = vshll.u32 %v2584_v53, %v402_v36  ;;  %vm420_vm2 = vcmp.lt.s32.totalorder %v401_v35, 1  ;;  %vm421_vm3 = vcmp.lt.s32.totalorder %v401_v35, 2 }
  0xfc   : > { %v406_v55 = vshrl.u32 %v2581_v47, %v403_v42  ;;  %v409_v56 = vshrl.u32 %v2582_v49, %v403_v42  ;;  %v412_v57 = vshrl.u32 %v2583_v51, %v403_v42  ;;  %v404_v58 = vshrl.u32 %v2580_v43, %v403_v42 }
  0xfd   : > { %v415_v59 = vshrl.u32 %v2584_v53, %v403_v42  ;;  %v418_v61 = vshrl.u32 %v2585_v60, %v403_v42  ;;  %v506_v1 = vsub.s32 32, %v505_v46  ;;  %vm422_vm4 = vcmp.lt.s32.totalorder %v401_v35, 3 }
  0xfe   : > { %v407_v62 = vor.u32 %v406_v55, %v405_v44  ;;  %v410_v63 = vor.u32 %v409_v56, %v408_v48  ;;  %v413_v0 = vor.u32 %v412_v57, %v411_v50  ;;  %vm423_vm5 = vcmp.lt.s32.totalorder %v401_v35, 4 }
  0xff   : > { %v416_v2 = vor.u32 %v415_v59, %v414_v52  ;;  %v419_v6 = vor.u32 %v418_v61, %v417_v54  ;;  %v508_v21 = vshll.u32 %v2580_v43, %v505_v46  ;;  %v509_v25 = vshrl.u32 %v2581_v47, %v506_v1 }
 0x100   : > { %v424_v8 = vsel %vm420_vm2, %v404_v58, %v407_v62  ;;  %v425_v9 = vsel %vm423_vm5, %v413_v0, 2102212464  ;;  %v428_v10 = vsel %vm420_vm2, %v407_v62, %v410_v63  ;;  %v432_v16 = vsel %vm420_vm2, %v410_v63, %v413_v0 }
 0x101   : > { %v426_v18 = vsel %vm422_vm4, %v410_v63, %v425_v9  ;;  %v429_v19 = vsel %vm423_vm5, %v416_v2, 920167782  ;;  %v433_v20 = vsel %vm423_vm5, %v419_v6, 1326507024  ;;  %v511_v26 = vshll.u32 %v2581_v47, %v505_v46 }
 0x102   : > { %v430_v22 = vsel %vm422_vm4, %v413_v0, %v429_v19  ;;  %v434_v23 = vsel %vm422_vm4, %v416_v2, %v433_v20  ;;  %v427_v27 = vsel %vm421_vm3, %v424_v8, %v426_v18  ;;  %v512_v30 = vshrl.u32 %v2582_v49, %v506_v1 }
 0x103   : > { %v431_v28 = vsel %vm421_vm3, %v428_v10, %v430_v22  ;;  %v435_v29 = vsel %vm421_vm3, %v432_v16, %v434_v23  ;;  %v510_v37 = vor.u32 %v509_v25, %v508_v21  ;;  %v514_v44 = vshll.u32 %v2582_v49, %v505_v46 }
 0x104   : > { %v2923_v31 = vmul.u32.u64.low %v2891_v38, %v435_v29  ;;  %v2924_v32 = vmul.u32.u64.high %v2891_v38, %v435_v29, %v2923_v31  ;;  %v2927_v34 = vmul.u32.u64.low %v2891_v38, %v431_v28  ;;  %v2928_v36 = vmul.u32.u64.high %v2891_v38, %v431_v28, %v2927_v34 }
 0x105   : > { %v513_v42 = vor.u32 %v512_v30, %v511_v26  ;;  %v515_v48 = vshrl.u32 %v2583_v51, %v506_v1  ;;  %v507_v35 = vshrl.u32 %v2580_v43, %v506_v1  ;;  %v517_v50 = vshll.u32 %v2583_v51, %v505_v46 }
 0x106   : > { %v518_v52 = vshrl.u32 %v2584_v53, %v506_v1  ;;  %v521_v54 = vshrl.u32 %v2585_v60, %v506_v1  ;;  %v443_v55 = vmul.u32 %v2891_v38, %v427_v27  ;;  %v520_v57 = vshll.u32 %v2584_v53, %v505_v46 }
 0x107   : > { %v516_v56 = vor.u32 %v515_v48, %v514_v44  ;;  %vm523_vm7 = vcmp.lt.s32.totalorder %v2899_v45, 1  ;;  %vm445_vm8 = vc.u32 %v2924_v32, %v2927_v34  ;;  %v446_v58 = vadd.s32 1, %v2928_v36 }
 0x108   : > { %v519_v59 = vor.u32 %v518_v52, %v517_v50  ;;  %vm524_vm9 = vcmp.lt.s32.totalorder %v2899_v45, 2  ;;  %v522_v61 = vor.u32 %v521_v54, %v520_v57  ;;  %vm525_vm10 = vcmp.lt.s32.totalorder %v2899_v45, 3 }
 0x109   : > { %vm526_vm11 = vcmp.lt.s32.totalorder %v2899_v45, 4  ;;  %v531_v62 = vsel %vm523_vm7, %v510_v37, %v513_v42  ;;  %v447_v38 = vsel %vm445_vm8, %v446_v58, %v2928_v36  ;;  %v535_v0 = vsel %vm523_vm7, %v513_v42, %v516_v56 }
 0x10a   : > { %v528_v63 = vsel %vm526_vm11, %v516_v56, 2102212464  ;;  %v532_v46 = vsel %vm526_vm11, %v519_v59, 920167782  ;;  %v448_v1 = vadd.s32 %v447_v38, %v443_v55  ;;  %v527_v2 = vsel %vm523_vm7, %v507_v35, %v510_v37 }
 0x10b   : > { %v533_v6 = vsel %vm525_vm10, %v516_v56, %v532_v46  ;;  %v536_v8 = vsel %vm526_vm11, %v522_v61, 1326507024  ;;  %v529_v9 = vsel %vm525_vm10, %v513_v42, %v528_v63  ;;  %v1020_v18 = vsel %vm1019_vm6, %v2896_v41, 0 }
 0x10c   : > { %v534_v10 = vsel %vm524_vm9, %v531_v62, %v533_v6  ;;  %v537_v16 = vsel %vm525_vm10, %v519_v59, %v536_v8  ;;  %v449_v19 = vadd.s32 536870912, %v448_v1  ;;  %v2961_v23 = vmul.f32 %v2889_v33, %v2866_v11 }
 0x10d   : > { %v538_v20 = vsel %vm524_vm9, %v535_v0, %v537_v16  ;;  %v2955_v21 = vmul.u32.u64.low %v2893_v39, %v534_v10  ;;  %v2956_v22 = vmul.u32.u64.high %v2893_v39, %v534_v10, %v2955_v21  ;;  %v1015_v41 = vand.u32 8388607, %v1008_v40 }
 0x10e   : > { %v2964_v25 = vmul.u32.u64.low %v2893_v39, %v538_v20  ;;  %v2965_v26 = vmul.u32.u64.high %v2893_v39, %v538_v20, %v2964_v25  ;;  %v2969_v27 = vshrl.u32 %v449_v19, 30  ;;  %v530_v28 = vsel %vm524_vm9, %v527_v2, %v529_v9 }
 0x10f   : > { %v1022_v29 = vand.u32 31, %v1020_v18  ;;  %v549_v31 = vadd.s32 1, %v2956_v22  ;;  %v546_v11 = vmul.u32 %v2893_v39, %v530_v28  ;;  %v1016_v33 = vor.u32 8388608, %v1015_v41 }
 0x110   : > { %v451_v30 = vshll.u32 %v2969_v27, 30  ;;  %vm548_vm12 = vc.u32 %v2965_v26, %v2955_v21  ;;  %v1115_v37 = vand.u32 2139095040, %v2961_v23  ;;  %v1112_v54 = vand.u32 2147483647, %v2961_v23 }
 0x111   : > { %v1023_v36 = vsub.s32 32, %v1022_v29  ;;  %v550_v44 = vsel %vm548_vm12, %v549_v31, %v2956_v22  ;;  %v1025_v52 = vshll.u32 %v2580_v43, %v1022_v29  ;;  %v1028_v56 = vshll.u32 %v2581_v47, %v1022_v29 }
 0x112   : > { %v2979_v42 = vsub.s32 %v448_v1, %v451_v30  ;;  %v551_v45 = vadd.s32 %v550_v44, %v546_v11  ;;  %v2989_v57 = vshll.u32 %v1016_v33, 8  ;;  %v1116_v58 = vshrl.u32 %v1115_v37, 23 }
 0x113   : > { %v1026_v48 = vshrl.u32 %v2581_v47, %v1023_v36  ;;  %v1029_v35 = vshrl.u32 %v2582_v49, %v1023_v36  ;;  %v1032_v39 = vshrl.u32 %v2583_v51, %v1023_v36  ;;  %v1021_v61 = vshrl.u32 %v1020_v18, 5 }
 0x114   : > { %v454_v50 = vsub.s32 0, %v2979_v42  ;;  %v552_v55 = vadd.s32 536870912, %v551_v45  ;;  %v1031_v38 = vshll.u32 %v2582_v49, %v1022_v29  ;;  %v1034_v0 = vshll.u32 %v2583_v51, %v1022_v29 }
 0x115   : > { %v1027_v62 = vor.u32 %v1026_v48, %v1025_v52  ;;  %v1030_v46 = vor.u32 %v1029_v35, %v1028_v56  ;;  %v1035_v1 = vshrl.u32 %v2584_v53, %v1023_v36  ;;  %v1037_v8 = vshll.u32 %v2584_v53, %v1022_v29 }
 0x116   : > { %v2012_v59 = vmin.u32 %v454_v50, %v2979_v42  ;;  %v2993_v63 = vshrl.u32 %v552_v55, 30  ;;  %v1033_v6 = vor.u32 %v1032_v39, %v1031_v38  ;;  %v1038_v9 = vshrl.u32 %v2585_v60, %v1023_v36 }
 0x117   : > { %v444_v10 = vadd.s32 %v2927_v34, %v2924_v32  ;;  %v1036_v18 = vor.u32 %v1035_v1, %v1034_v0  ;;  %v2039_v19 = vadd.s32 4294967169, %v1116_v58  ;;  %vm1040_vm13 = vcmp.lt.s32.totalorder %v1021_v61, 1 }
 0x118   : > { %v456_v2 = vclz %v2012_v59  ;;  %v554_v16 = vshll.u32 %v2993_v63, 30  ;;  %v1039_v22 = vor.u32 %v1038_v9, %v1037_v8  ;;  %vm1043_vm14 = vcmp.lt.s32.totalorder %v1021_v61, 4 }
 0x119   : > { %vm1042_vm15 = vcmp.lt.s32.totalorder %v1021_v61, 3  ;;  %v1048_v41 = vsel %vm1040_vm13, %v1027_v62, %v1030_v46  ;;  %v1049_v28 = vsel %vm1043_vm14, %v1036_v18, 920167782  ;;  %v1045_v29 = vsel %vm1043_vm14, %v1033_v6, 2102212464 }
 0x11a   : > { %v2013_v20 = vadd.s32 4294967294, %v456_v2  ;;  %v3002_v25 = vsub.s32 %v551_v45, %v554_v16  ;;  %v1050_v30 = vsel %vm1042_vm15, %v1033_v6, %v1049_v28  ;;  %v1053_v31 = vsel %vm1043_vm14, %v1039_v22, 1326507024 }
 0x11b   : > { %v1024_v11 = vshrl.u32 %v2580_v43, %v1023_v36  ;;  %v1052_v33 = vsel %vm1040_vm13, %v1030_v46, %v1033_v6  ;;  %vm1041_vm2 = vcmp.lt.s32.totalorder %v1021_v61, 2  ;;  %v1054_v45 = vsel %vm1042_vm15, %v1036_v18, %v1053_v31 }
 0x11c   : > { %vm2014_vm0 = vcmp.lt.s32.totalorder %v2013_v20, 0  ;;  %v557_v34 = vsub.s32 0, %v3002_v25  ;;  %v1046_v50 = vsel %vm1042_vm15, %v1030_v46, %v1045_v29  ;;  %v1051_v52 = vsel %vm1041_vm2, %v1048_v41, %v1050_v30 }
 0x11d   : > { %v459_v32 = vsel %vm2014_vm0, 0, %v2013_v20  ;;  %v1044_v35 = vsel %vm1040_vm13, %v1024_v11, %v1027_v62  ;;  %v1055_v56 = vsel %vm1041_vm2, %v1052_v33, %v1054_v45  ;;  %vm3019_vm3 = vcmp.le.f32.partialorder %v388_v15, 0.7853982 }
 0x11e   : > { %v460_v37 = vsub.s32 32, %v459_v32  ;;  %v464_v44 = vsub.s32 4294967266, %v459_v32  ;;  %v2016_v48 = vmin.u32 %v557_v34, %v3002_v25  ;;  %v461_v39 = vshll.u32 %v2979_v42, %v459_v32 }
 0x11f   : > { %vm493_vm4 = vcmp.lt.s32.totalorder %v2872_v13, 0  ;;  %v3025_v62 = vmul.u32.u64.low %v2989_v57, %v1055_v56  ;;  %v3026_v38 = vmul.u32.u64.high %v2989_v57, %v1055_v56, %v3025_v62  ;;  %v1122_v46 = vadd.s32 1, %v2039_v19 }
 0x120   : > { %v462_v36 = vshrl.u32 %v444_v10, %v460_v37  ;;  %v465_v55 = vadd.s32 127, %v464_v44  ;;  %v559_v59 = vclz %v2016_v48  ;;  %v474_v15 = vsub.s32 4, %v2969_v27 }
 0x121   : > { %v3029_v1 = vmul.u32.u64.low %v2989_v57, %v1051_v52  ;;  %v3030_v2 = vmul.u32.u64.high %v2989_v57, %v1051_v52, %v3029_v1  ;;  %v3036_v8 = vand.u32 8388607, %v1112_v54  ;;  %vm1123_vm5 = vcmp.gt.s32.totalorder %v1122_v46, 0 }
 0x122   : > { %v463_v0 = vor.u32 %v462_v36, %v461_v39  ;;  %v466_v42 = vshll.u32 %v465_v55, 23  ;;  %v2017_v6 = vadd.s32 4294967294, %v559_v59  ;;  %v547_v10 = vadd.s32 %v2955_v21, %v2965_v26 }
 0x123   : > { %v1047_v16 = vsel %vm1041_vm2, %v1044_v35, %v1046_v50  ;;  %v1124_v18 = vsel %vm1123_vm5, %v1122_v46, 0  ;;  %v577_v20 = vsub.s32 4, %v2993_v63  ;;  %vm1065_vm7 = vc.u32 %v3026_v38, %v3029_v1 }
 0x124   : > { %v467_v9 = vor.u32 4788187, %v466_v42  ;;  %v470_v19 = vcvt.s32.f32 %v463_v0  ;;  %vm2018_vm6 = vcmp.lt.s32.totalorder %v2017_v6, 0  ;;  %v1066_v28 = vadd.s32 1, %v3030_v2 }
 0x125   : > { %v562_v41 = vsel %vm2018_vm6, 0, %v2017_v6  ;;  %v1126_v29 = vand.u32 31, %v1124_v18  ;;  %v475_v30 = vsel %vm390_vm1, %v474_v15, %v2969_v27  ;;  %v1063_v61 = vmul.u32 %v2989_v57, %v1047_v16 }
 0x126   : > { %v468_v22 = vand.u32 2147483647, %v467_v9  ;;  %v563_v21 = vsub.s32 32, %v562_v41  ;;  %v567_v26 = vsub.s32 4294967266, %v562_v41  ;;  %v1067_v32 = vsel %vm1065_vm7, %v1066_v28, %v3030_v2 }
 0x127   : > { %v1120_v34 = vor.u32 8388608, %v3036_v8  ;;  %v1127_v11 = vsub.s32 32, %v1126_v29  ;;  %v564_v33 = vshll.u32 %v3002_v25, %v562_v41  ;;  %v1068_v45 = vadd.s32 %v1067_v32, %v1063_v61 }
 0x128   : > { %v471_v31 = vmul.f32 %v470_v19, %v468_v22  ;;  %v565_v37 = vshrl.u32 %v547_v10, %v563_v21  ;;  %v568_v44 = vadd.s32 127, %v567_v26  ;;  %v477_v35 = vsel %vm3019_vm3, 0, %v475_v30 }
 0x129   : > { %v3057_v27 = vsel %vm493_vm4, %v577_v20, %v2993_v63  ;;  %v3059_v57 = vshrl.u32 %v1124_v18, 5  ;;  %v1069_v39 = vadd.s32 536870912, %v1068_v45  ;;  %v1129_v36 = vshll.u32 %v2580_v43, %v1126_v29 }
 0x12a   : > { %v472_v48 = vxor.u32 2147483648, %v471_v31  ;;  %v566_v50 = vor.u32 %v565_v37, %v564_v33  ;;  %v569_v52 = vshll.u32 %v568_v44, 23  ;;  %v1130_v55 = vshrl.u32 %v2581_v47, %v1127_v11 }
 0x12b   : > { %v1132_v56 = vshll.u32 %v2581_v47, %v1126_v29  ;;  %v1133_v59 = vshrl.u32 %v2582_v49, %v1127_v11  ;;  %v3070_v46 = vshrl.u32 %v1069_v39, 30  ;;  %v1136_v0 = vshrl.u32 %v2583_v51, %v1127_v11 }
 0x12c   : > { %v473_v25 = vsel %vm390_vm1, %v472_v48, %v471_v31  ;;  %v570_v62 = vor.u32 4788187, %v569_v52  ;;  %v1135_v42 = vshll.u32 %v2582_v49, %v1126_v29  ;;  %v1138_v2 = vshll.u32 %v2583_v51, %v1126_v29  ;;  %v1241_v31 = vld [vmem:[%s3344_s5] sm:$0xf] }
 0x12d   : > { %v476_v63 = vsel %vm3019_vm3, %v2869_v12, %v473_v25  ;;  %v1139_v15 = vshrl.u32 %v2584_v53, %v1127_v11  ;;  %v573_v6 = vcvt.s32.f32 %v566_v50  ;;  %v1071_v8 = vshll.u32 %v3070_v46, 30 }
 0x12e   : > { %2267 = vcosq.f32 %v476_v63  ;;  %v571_v47 = vand.u32 2147483647, %v570_v62  ;;  %v1131_v58 = vor.u32 %v1130_v55, %v1129_v36  ;;  %v1141_v10 = vshll.u32 %v2584_v53, %v1126_v29 }
 0x12f   : > { %2269 = vsinq.f32 %v476_v63  ;;  %v1140_v9 = vor.u32 %v1139_v15, %v1138_v2  ;;  %v1142_v16 = vshrl.u32 %v2585_v60, %v1127_v11  ;;  %v3080_v19 = vsub.s32 %v1068_v45, %v1071_v8 }
 0x130   : > { %v574_v18 = vmul.f32 %v573_v6, %v571_v47  ;;  %v1134_v49 = vor.u32 %v1133_v59, %v1132_v56  ;;  %v1137_v51 = vor.u32 %v1136_v0, %v1135_v42  ;;  %v3082_v20 = vand.u32 3, %v477_v35 }
 0x131   : > { %vm3086_vm8 = vcmp.le.f32.partialorder %v491_v17, 0.7853982  ;;  %v1143_v41 = vor.u32 %v1142_v16, %v1141_v10  ;;  %v1074_v60 = vsub.s32 0, %v3080_v19  ;;  %vm1147_vm9 = vcmp.lt.s32.totalorder %v3059_v57, 4 }
 0x132   : > { %v575_v28 = vxor.u32 2147483648, %v574_v18  ;;  %v580_v53 = vsel %vm3086_vm8, 0, %v3057_v27  ;;  %vm1144_vm10 = vcmp.lt.s32.totalorder %v3059_v57, 1  ;;  %vm1146_vm11 = vcmp.lt.s32.totalorder %v3059_v57, 3 }
 0x133   : > { %v1153_v17 = vsel %vm1147_vm9, %v1140_v9, 920167782  ;;  %v3101_v29 = vshll.u32 %v1120_v34, 8  ;;  %v2036_v21 = vmin.u32 %v1074_v60, %v3080_v19  ;;  %v1149_v26 = vsel %vm1147_vm9, %v1137_v51, 2102212464 }
 0x134   : > { %v576_v30 = vsel %vm493_vm4, %v575_v28, %v574_v18  ;;  %v1152_v61 = vsel %vm1144_vm10, %v1131_v58, %v1134_v49  ;;  %v1154_v34 = vsel %vm1146_vm11, %v1137_v51, %v1153_v17  ;;  %v1156_v33 = vsel %vm1144_vm10, %v1134_v49, %v1137_v51 }
 0x135   : > { %v579_v32 = vsel %vm3086_vm8, %v2872_v13, %v576_v30  ;;  %v1157_v37 = vsel %vm1147_vm9, %v1143_v41, 1326507024  ;;  %v1076_v44 = vclz %v2036_v21  ;;  %v1128_v45 = vshrl.u32 %v2580_v43, %v1127_v11 }
 0x136   : > { %2271 = vcosq.f32 %v579_v32  ;;  %vm1145_vm12 = vcmp.lt.s32.totalorder %v3059_v57, 2  ;;  %v1158_v27 = vsel %vm1146_vm11, %v1140_v9, %v1157_v37  ;;  %v1246_v50 = vrot.slane %v1241_v31, %v357_v4 }
 0x137   : > { %2273 = vsinq.f32 %v579_v32  ;;  %v1155_v35 = vsel %vm1145_vm12, %v1152_v61, %v1154_v34  ;;  %v2037_v39 = vadd.s32 4294967294, %v1076_v44  ;;  %v1148_v36 = vsel %vm1144_vm10, %v1128_v45, %v1131_v58 }
 0x138   : > { %v2268_v48 = vpop.eup %2267  ;;  %v1150_v43 = vsel %vm1146_vm11, %v1134_v49, %v1149_v26  ;;  %v1159_v11 = vsel %vm1145_vm12, %v1156_v33, %v1158_v27  ;;  %v1250_v59 = vrot.slane %v1241_v31, %v361_v5  ;;  %v1254_v42 = vrot.slane %v1241_v31, %v365_v7 }
 0x139   : > { %v2270_v52 = vpop.eup %2269  ;;  %v487_v25 = vxor.u32 2147483648, %v2268_v48  ;;  %v3134_v55 = vmul.u32.u64.low %v3101_v29, %v1159_v11  ;;  %v3135_v56 = vmul.u32.u64.high %v3101_v29, %v1159_v11, %v3134_v55  ;;  %vm2038_vm13 = vcmp.lt.s32.totalorder %v2037_v39, 0 }
 0x13a   : > { %v484_v4 = vxor.u32 2147483648, %v2270_v52  ;;  %v3140_v63 = vmul.u32.u64.low %v3101_v29, %v1155_v35  ;;  %v3141_v62 = vmul.u32.u64.high %v3101_v29, %v1155_v35, %v3140_v63  ;;  %v1079_v0 = vsel %vm2038_vm13, 0, %v2037_v39 }
 0x13b   : > { %v1258_v2 = vrot.slane %v1241_v31, %v369_v24  ;;  %v1263_v15 = vstv %s1240_s30  ;;  %vm483_vm14 = vcmp.eq.s32.totalorder %v3082_v20, 0  ;;  %vm486_vm15 = vcmp.eq.s32.totalorder %v3082_v20, 2 }
 0x13c   : > { %v1084_v5 = vsub.s32 4294967266, %v1079_v0  ;;  %v1151_v47 = vsel %vm1145_vm12, %v1148_v36, %v1150_v43  ;;  %v488_v6 = vsel %vm486_vm15, %v487_v25, %v2270_v52  ;;  %v584_v8 = vand.u32 3, %v580_v53 }
 0x13d   : > { %vm1169_vm0 = vc.u32 %v3135_v56, %v3140_v63  ;;  %v1264_v7 = vmul.f32 %v1263_v15, %v1246_v50  ;;  %v485_v58 = vsel %vm483_vm14, %v2268_v48, %v484_v4  ;;  %v1170_v24 = vadd.s32 1, %v3141_v62 }
 0x13e   : > { %v1085_v3 = vadd.s32 127, %v1084_v5  ;;  %v1265_v9 = vmul.f32 %v1263_v15, %v1250_v59  ;;  %v1080_v10 = vsub.s32 32, %v1079_v0  ;;  %v1167_v16 = vmul.u32 %v3101_v29, %v1151_v47 }
 0x13f   : > { %v1266_v18 = vmul.f32 %v1263_v15, %v1254_v42  ;;  %v1267_v57 = vmul.f32 %v1263_v15, %v1258_v2  ;;  %1268 = vst [vmem:[%s2846_s14] sm:$0xff] %v1264_v7  ;;  %vm482_vm1 = vcmp.lt.s32.totalorder %v3082_v20, 2  ;;  %v1064_v51 = vadd.s32 %v3029_v1, %v3026_v38 }
 0x140   : > { %v2272_v49 = vpop.eup %2271  ;;  %v1171_v22 = vsel %vm1169_vm0, %v1170_v24, %v3141_v62  ;;  %1269 = vst [vmem:[%s2846_s14 + $0x8] sm:$0xff] %v1265_v9  ;;  %v489_v28 = vsel %vm482_vm1, %v485_v58, %v488_v6  ;;  %v1086_v60 = vshll.u32 %v1085_v3, 23  ;;  %vm480_vm2 = vweird.f32 %v2869_v12 }
 0x141   : > { %v2274_v41 = vpop.eup %2273  ;;  %v590_v53 = vxor.u32 2147483648, %v2272_v49  ;;  %v1172_v17 = vadd.s32 %v1171_v22, %v1167_v16  ;;  %1270 = vst [vmem:[%s2846_s14 + $0x10] sm:$0xff] %v1266_v18  ;;  %1271 = vst [vmem:[%s2846_s14 + $0x18] sm:$0xff] %v1267_v57  ;;  %vm589_vm3 = vcmp.eq.s32.totalorder %v584_v8, 2  ;;  %vm586_vm4 = vcmp.eq.s32.totalorder %v584_v8, 0 }
 0x142   : > { %v587_v29 = vxor.u32 2147483648, %v2274_v41  ;;  %v1082_v20 = vshrl.u32 %v1064_v51, %v1080_v10  ;;  %v490_v26 = vsel %vm480_vm2, nan, %v489_v28  ;;  %vm583_vm5 = vweird.f32 %v2872_v13 }
 0x143   : > { %v591_v30 = vsel %vm589_vm3, %v590_v53, %v2274_v41  ;;  %v1173_v21 = vadd.s32 536870912, %v1172_v17  ;;  %vm585_vm6 = vcmp.lt.s32.totalorder %v584_v8, 2  ;;  %v1081_v61 = vshll.u32 %v3080_v19, %v1079_v0 }
 0x144   : > { %v588_v38 = vsel %vm586_vm4, %v2272_v49, %v587_v29  ;;  %v1087_v31 = vor.u32 4788187, %v1086_v60  ;;  %vm1010_vm8 = vcmp.lt.s32.totalorder %v2875_v14, 0  ;;  %v1168_v43 = vadd.s32 %v3140_v63, %v3135_v56 }
 0x145   : > { %v592_v1 = vsel %vm585_vm6, %v588_v38, %v591_v30  ;;  %v1174_v32 = vshrl.u32 %v1173_v21, 30  ;;  %v1083_v33 = vor.u32 %v1082_v20, %v1081_v61  ;;  %vm3174_vm9 = vcmp.le.f32.partialorder %v1008_v40, 0.7853982 }
 0x146   : > { %v593_v34 = vsel %vm583_vm5, nan, %v592_v1  ;;  %v1088_v44 = vand.u32 2147483647, %v1087_v31  ;;  %v1094_v15 = vsub.s32 4, %v3070_v46  ;;  %vm1114_vm10 = vcmp.lt.s32.totalorder %v2961_v23, 0 }
 0x147   : > { %v1175_v37 = vshll.u32 %v1174_v32, 30  ;;  %v2125_v12 = vpack.c.bf16 %v593_v34, %v490_v26  ;;  %v1090_v48 = vcvt.s32.f32 %v1083_v33  ;;  %v1198_v6 = vsub.s32 4, %v1174_v32 }
 0x148   : > { %v1095_v40 = vsel %vm1010_vm8, %v1094_v15, %v3070_v46  ;;  %vm1113_vm11 = vcmp.le.f32.partialorder %v1112_v54, 0.7853982  ;;  %vm1100_vm0 = vweird.f32 %v2875_v14  ;;  %vm1204_vm3 = vweird.f32 %v2961_v23 }
 0x149   : > { %v1176_v45 = vsub.s32 %v1172_v17, %v1175_v37  ;;  %1236 = vst [vmem:[#allocation2] sm:$0xff] %v2125_v12  ;;  %v1091_v27 = vmul.f32 %v1090_v48, %v1088_v44  ;;  %v1097_v8 = vsel %vm3174_vm9, 0, %v1095_v40  ;;  %v1199_v3 = vsel %vm1114_vm10, %v1198_v6, %v1174_v32 }
 0x14a   : > { %v1101_v24 = vadd.s32 3, %v1097_v8  ;;  %v1201_v46 = vsel %vm1113_vm11, 0, %v1199_v3 }
 0x14b   : > { %v1178_v35 = vsub.s32 0, %v1176_v45  ;;  %v1092_v13 = vxor.u32 2147483648, %v1091_v27  ;;  %v1205_v51 = vadd.s32 3, %v1201_v46 }
 0x14c   : > { %v1102_v18 = vand.u32 3, %v1101_v24 }
 0x14d   : > { %v2040_v50 = vmin.u32 %v1178_v35, %v1176_v45  ;;  %v1093_v36 = vsel %vm1010_vm8, %v1092_v13, %v1091_v27  ;;  %v1206_v28 = vand.u32 3, %v1205_v51 }
 0x14e   : > { %v1096_v0 = vsel %vm3174_vm9, %v2875_v14, %v1093_v36  ;;  %vm1104_vm12 = vcmp.eq.s32.totalorder %v1102_v18, 0  ;;  %vm1107_vm13 = vcmp.eq.s32.totalorder %v1102_v18, 2  ;;  %vm1103_vm14 = vcmp.lt.s32.totalorder %v1102_v18, 2 }
 0x14f   : > { %v1180_v52 = vclz %v2040_v50  ;;  %2275 = vcosq.f32 %v1096_v0  ;;  %vm1211_vm15 = vcmp.eq.s32.totalorder %v1206_v28, 2  ;;  %vm1208_vm1 = vcmp.eq.s32.totalorder %v1206_v28, 0 }
 0x150   : > { %2277 = vsinq.f32 %v1096_v0  ;;  %vm1207_vm2 = vcmp.lt.s32.totalorder %v1206_v28, 2 }
 0x151   : > { %v2041_v39 = vadd.s32 4294967294, %v1180_v52 }
 0x153   : > { %vm2042_vm7 = vcmp.lt.s32.totalorder %v2041_v39, 0 }
 0x154   : > { %v1183_v19 = vsel %vm2042_vm7, 0, %v2041_v39 }
 0x155   : > { %v1184_v11 = vsub.s32 32, %v1183_v19  ;;  %v1188_v25 = vsub.s32 4294967266, %v1183_v19  ;;  %v1185_v59 = vshll.u32 %v1176_v45, %v1183_v19 }
 0x157   : > { %v1186_v4 = vshrl.u32 %v1168_v43, %v1184_v11  ;;  %v1189_v62 = vadd.s32 127, %v1188_v25 }
 0x159   : > { %v1187_v42 = vor.u32 %v1186_v4, %v1185_v59  ;;  %v1190_v2 = vshll.u32 %v1189_v62, 23  ;;  %v2276_v10 = vpop.eup %2275 }
 0x15a   : > { %v2278_v16 = vpop.eup %2277  ;;  %v1108_v49 = vxor.u32 2147483648, %v2276_v10 }
 0x15b   : > { %v1191_v56 = vor.u32 4788187, %v1190_v2  ;;  %v1194_v5 = vcvt.s32.f32 %v1187_v42  ;;  %v1105_v57 = vxor.u32 2147483648, %v2278_v16 }
 0x15c   : > { %v1109_v41 = vsel %vm1107_vm13, %v1108_v49, %v2278_v16 }
 0x15d   : > { %v1192_v63 = vand.u32 2147483647, %v1191_v56  ;;  %v1106_v22 = vsel %vm1104_vm12, %v2276_v10, %v1105_v57 }
 0x15e   : > { %v1110_v60 = vsel %vm1103_vm14, %v1106_v22, %v1109_v41 }
 0x15f   : > { %v1195_v47 = vmul.f32 %v1194_v5, %v1192_v63  ;;  %v1111_v20 = vsel %vm1100_vm0, nan, %v1110_v60 }
 0x161   : > { %v1196_v7 = vxor.u32 2147483648, %v1195_v47 }
 0x163   : > { %v1197_v58 = vsel %vm1114_vm10, %v1196_v7, %v1195_v47 }
 0x164   : > { %v1200_v9 = vsel %vm1113_vm11, %v2961_v23, %v1197_v58 }
 0x165   : > { %2279 = vcosq.f32 %v1200_v9 }
 0x166   : > { %2281 = vsinq.f32 %v1200_v9 }
 0x16f   : > { %v2280_v54 = vpop.eup %2279 }
 0x170   : > { %v2282_v53 = vpop.eup %2281  ;;  %v1212_v17 = vxor.u32 2147483648, %v2280_v54 }
 0x171   : > { %v1209_v29 = vxor.u32 2147483648, %v2282_v53 }
 0x172   : > { %v1213_v30 = vsel %vm1211_vm15, %v1212_v17, %v2282_v53 }
 0x173   : > { %v1210_v21 = vsel %vm1208_vm1, %v2280_v54, %v1209_v29 }
 0x174   : > { %v1214_v26 = vsel %vm1207_vm2, %v1210_v21, %v1213_v30 }
 0x175   : > { %v1215_v38 = vsel %vm1204_vm3, nan, %v1214_v26 }
 0x176   : > { %v2126_v1 = vpack.c.bf16 %v1215_v38, %v1111_v20 }
 0x178   : > { %1237 = vst [vmem:[#allocation2 + $0x8] sm:$0xff] %v2126_v1 }
 0x179 PF: > { %v2283_v14 = vld [vmem:[%s2831_s8 + $0x4] ss:$16 sps:$4 sm:$0xff]   ;;  %v2285_v61 = vld [vmem:[%s2831_s8] ss:$16 sps:$4 sm:$0xff]   ;;  %v2311_v19 = vld [vmem:[%s2831_s8 + $0xc] ss:$16 sps:$4 sm:$0xff]  }
 0x17a   : > { %1488 = vmatprep.subr.bf16.mxu0 %v2283_v14  ;;  %v2286_v31 = vld [vmem:[%s2831_s8 + $0x24] ss:$16 sps:$4 sm:$0xff]   ;;  %v2288_v23 = vld [vmem:[%s2831_s8 + $0x20] ss:$16 sps:$4 sm:$0xff]   ;;  %v2309_v11 = vld [vmem:[%s2831_s8 + $0x8] ss:$16 sps:$4 sm:$0xff]  }
 0x17b   : > { %1489 = vmatpush1.bf16.xpose.msra.mxu0 %v2285_v61  ;;  %v2289_v32 = vld [vmem:[%s2831_s8 + $0x44] ss:$16 sps:$4 sm:$0xff]   ;;  %v2291_v37 = vld [vmem:[%s2831_s8 + $0x40] ss:$16 sps:$4 sm:$0xff]   ;;  %v2314_v55 = vld [vmem:[%s2831_s8 + $0x2c] ss:$16 sps:$4 sm:$0xff]  }
 0x17c   : > { %1490 = vmatprep.subr.bf16.mxu0 %v2286_v31  ;;  %v1274_v34 = vld [vmem:[#allocation2] sm:$0xff]  ;;  %v2312_v59 = vld [vmem:[%s2831_s8 + $0x28] ss:$16 sps:$4 sm:$0xff]   ;;  %v2317_v4 = vld [vmem:[%s2831_s8 + $0x4c] ss:$16 sps:$4 sm:$0xff]   ;;  %v2586_v60 = vmov 0  }
 0x17d   : > { %v2048_v33 = vcombine.high %v1274_v34, %v1274_v34  ;;  %v2292_v12 = vld [vmem:[%s2831_s8 + $0x64] ss:$16 sps:$4 sm:$0xff]   ;;  %v2294_v44 = vld [vmem:[%s2831_s8 + $0x60] ss:$16 sps:$4 sm:$0xff]   ;;  %v2047_v43 = vcombine.low %v1274_v34, %v1274_v34  ;;  %v2315_v62 = vld [vmem:[%s2831_s8 + $0x48] ss:$16 sps:$4 sm:$0xff]   ;;  %1804 = vmatprep.mubr.bf16.mxu1 %v2586_v60 }
 0x17e   : > { %v2295_v45 = vld [vmem:[%s2831_s8 + $0x84] ss:$16 sps:$4 sm:$0xff]   ;;  %v2297_v48 = vld [vmem:[%s2831_s8 + $0x80] ss:$16 sps:$4 sm:$0xff]   ;;  %v2320_v0 = vld [vmem:[%s2831_s8 + $0x6c] ss:$16 sps:$4 sm:$0xff]  }
 0x17f   : > { %1520 = vmatprep.mubr.bf16.mxu0 %v2048_v33  ;;  %v2298_v35 = vld [vmem:[%s2831_s8 + $0xa4] ss:$16 sps:$4 sm:$0xff]   ;;  %v2300_v27 = vld [vmem:[%s2831_s8 + $0xa0] ss:$16 sps:$4 sm:$0xff]   ;;  %v1275_v36 = vld [vmem:[#allocation2 + $0x8] sm:$0xff]  ;;  %s2045_s24 = sshll.u32 %s2561_s28, 1 }
 0x180   : > { %v2301_v50 = vld [vmem:[%s2831_s8 + $0xc4] ss:$16 sps:$4 sm:$0xff]   ;;  %v2303_v52 = vld [vmem:[%s2831_s8 + $0xc0] ss:$16 sps:$4 sm:$0xff]   ;;  %v2050_v25 = vcombine.high %v1275_v36, %v1275_v36  ;;  %v2318_v42 = vld [vmem:[%s2831_s8 + $0x68] ss:$16 sps:$4 sm:$0xff]   ;;  %v2049_v8 = vcombine.low %v1275_v36, %v1275_v36  ;;  %s1273_s20 = sadd.s32 %s2557_s27, %s2045_s24 }
 0x181   : > { %v2304_v13 = vld [vmem:[%s2831_s8 + $0xe4] ss:$16 sps:$4 sm:$0xff]   ;;  %v2306_v39 = vld [vmem:[%s2831_s8 + $0xe0] ss:$16 sps:$4 sm:$0xff]   ;;  %v2323_v2 = vld [vmem:[%s2831_s8 + $0x8c] ss:$16 sps:$4 sm:$0xff]   ;;  %s1308_s10 = scalar_lea.vmem %s3342_s3, %s1273_s20 }
 0x182   : > { %v2321_v15 = vld [vmem:[%s2831_s8 + $0x88] ss:$16 sps:$4 sm:$0xff]   ;;  %v2326_v56 = vld [vmem:[%s2831_s8 + $0xac] ss:$16 sps:$4 sm:$0xff]   ;;  %v2335_v7 = vld [vmem:[%s2837_s18 + $0x4] ss:$16 sps:$4 sm:$0xff]  }
 0x183   : > { %1491 = vmatpush1.bf16.xpose.msra.mxu0 %v2288_v23  ;;  %v2324_v63 = vld [vmem:[%s2831_s8 + $0xa8] ss:$16 sps:$4 sm:$0xff]   ;;  %v2329_v5 = vld [vmem:[%s2831_s8 + $0xcc] ss:$16 sps:$4 sm:$0xff]   ;;  %v2337_v58 = vld [vmem:[%s2837_s18] ss:$16 sps:$4 sm:$0xff]   ;;  %1772 = vmatprep.subr.bf16.mxu1 %v2335_v7 }
 0x184   : > { %1492 = vmatprep.subr.bf16.mxu0 %v2289_v32  ;;  %v2327_v40 = vld [vmem:[%s2831_s8 + $0xc8] ss:$16 sps:$4 sm:$0xff]   ;;  %v2332_v47 = vld [vmem:[%s2831_s8 + $0xec] ss:$16 sps:$4 sm:$0xff]   ;;  %1773 = vmatpush1.bf16.msra.mxu1 %v2337_v58  ;;  %v2338_v3 = vld [vmem:[%s2837_s18 + $0x24] ss:$16 sps:$4 sm:$0xff]  }
 0x185   : > { %v2330_v6 = vld [vmem:[%s2831_s8 + $0xe8] ss:$16 sps:$4 sm:$0xff]   ;;  %v2340_v24 = vld [vmem:[%s2837_s18 + $0x20] ss:$16 sps:$4 sm:$0xff]   ;;  %1774 = vmatprep.subr.bf16.mxu1 %v2338_v3  ;;  %v2341_v9 = vld [vmem:[%s2837_s18 + $0x44] ss:$16 sps:$4 sm:$0xff]  }
 0x186   : > { %v2343_v10 = vld [vmem:[%s2837_s18 + $0x40] ss:$16 sps:$4 sm:$0xff]   ;;  %v2344_v16 = vld [vmem:[%s2837_s18 + $0x64] ss:$16 sps:$4 sm:$0xff]   ;;  %v2361_v53 = vld [vmem:[%s2837_s18 + $0xc] ss:$16 sps:$4 sm:$0xff]  }
 0x187   : > { %v2346_v46 = vld [vmem:[%s2837_s18 + $0x60] ss:$16 sps:$4 sm:$0xff]   ;;  %v2347_v18 = vld [vmem:[%s2837_s18 + $0x84] ss:$16 sps:$4 sm:$0xff]   ;;  %v2046_v17 = vld [vmem:[%s1308_s10] ss:$0 sm:$0xff] }
 0x188   : > { %1775 = vmatpush1.bf16.msra.mxu1 %v2340_v24  ;;  %v2349_v57 = vld [vmem:[%s2837_s18 + $0x80] ss:$16 sps:$4 sm:$0xff]   ;;  %v2350_v49 = vld [vmem:[%s2837_s18 + $0xa4] ss:$16 sps:$4 sm:$0xff]   ;;  %v2359_v23 = vld [vmem:[%s2837_s18 + $0x8] ss:$16 sps:$4 sm:$0xff]  }
 0x189   : > { %1776 = vmatprep.subr.bf16.mxu1 %v2341_v9  ;;  %v2352_v51 = vld [vmem:[%s2837_s18 + $0xa0] ss:$16 sps:$4 sm:$0xff]   ;;  %v2353_v22 = vld [vmem:[%s2837_s18 + $0xc4] ss:$16 sps:$4 sm:$0xff]   ;;  %v2364_v34 = vld [vmem:[%s2837_s18 + $0x2c] ss:$16 sps:$4 sm:$0xff]  }
 0x18a   : > { %v2355_v41 = vld [vmem:[%s2837_s18 + $0xc0] ss:$16 sps:$4 sm:$0xff]   ;;  %v2356_v28 = vld [vmem:[%s2837_s18 + $0xe4] ss:$16 sps:$4 sm:$0xff]   ;;  %v2362_v33 = vld [vmem:[%s2837_s18 + $0x28] ss:$16 sps:$4 sm:$0xff]  }
 0x18b   : > { %1493 = vmatpush1.bf16.xpose.msra.mxu0 %v2291_v37  ;;  %v2358_v54 = vld [vmem:[%s2837_s18 + $0xe0] ss:$16 sps:$4 sm:$0xff]   ;;  %v2367_v37 = vld [vmem:[%s2837_s18 + $0x4c] ss:$16 sps:$4 sm:$0xff]   ;;  %s2127_s27 = sshll.u32 %s2561_s28, 9  ;;  %s3383_s15 = sld [smem:[#allocation20_spill]] }
 0x18c   : > { %1494 = vmatprep.subr.bf16.mxu0 %v2292_v12  ;;  %1777 = vmatpush1.bf16.msra.mxu1 %v2343_v10  ;;  %v2365_v12 = vld [vmem:[%s2837_s18 + $0x48] ss:$16 sps:$4 sm:$0xff]   ;;  %v1575_v36 = vld [vmem:[%s2846_s14] sm:$0xff]  ;;  %s1863_s28 = scalar_lea.sflag [#allocation5], %s333_s2  ;;  %p3384_p1 = scmp.ne.s32.totalorder %s3367_s29, 0 }
 0x18d   : > { %1778 = vmatprep.subr.bf16.mxu1 %v2344_v16  ;;  %s2587_s26 = smov [#allocation8]  }
 0x18e   : > { %s2451_s9 = sshll.u32 %s2587_s26, 4  ;;  %s2452_s9 = int_to_ptr.vmem [resolvable:$false] %s2451_s9 }
 0x18f   : > { %s2453_s13 = scalar_lea.vmem %s2452_s9, 1024 }
 0x190   : > { %1779 = vmatpush1.bf16.msra.mxu1 %v2346_v46 }
 0x191   : > { %1780 = vmatprep.subr.bf16.mxu1 %v2347_v18  ;;  %s3273_s16 = scalar_lea.hbm %s3383_s15, %s2127_s27 }
 0x193   : > { %1495 = vmatpush1.bf16.xpose.msra.mxu0 %v2294_v44  ;;  %v2370_v44 = vld [vmem:[%s2837_s18 + $0x6c] ss:$16 sps:$4 sm:$0xff]  }
 0x194   : > { %1496 = vmatprep.subr.bf16.mxu0 %v2295_v45  ;;  %1781 = vmatpush1.bf16.msra.mxu1 %v2349_v57  ;;  %v2368_v45 = vld [vmem:[%s2837_s18 + $0x68] ss:$16 sps:$4 sm:$0xff]  }
 0x195   : > { %1782 = vmatprep.subr.bf16.mxu1 %v2350_v49 }
 0x198   : > { %1783 = vmatpush1.bf16.msra.mxu1 %v2352_v51 }
 0x199   : > { %1784 = vmatprep.subr.bf16.mxu1 %v2353_v22 }
 0x19b   : > { %1497 = vmatpush1.bf16.xpose.msra.mxu0 %v2297_v48  ;;  %v2373_v48 = vld [vmem:[%s2837_s18 + $0x8c] ss:$16 sps:$4 sm:$0xff]  }
 0x19c   : > { %1498 = vmatprep.subr.bf16.mxu0 %v2298_v35  ;;  %1785 = vmatpush1.bf16.msra.mxu1 %v2355_v41  ;;  %v2371_v35 = vld [vmem:[%s2837_s18 + $0x88] ss:$16 sps:$4 sm:$0xff]  }
 0x19d   : > { %1786 = vmatprep.subr.bf16.mxu1 %v2356_v28 }
 0x1a0   : > { %1787 = vmatpush1.bf16.msra.mxu1 %v2358_v54 }
 0x1a1   : > { %1813 = vmatprep.subr.bf16.mxu1 %v2361_v53 }
 0x1a3   : > { %1499 = vmatpush1.bf16.xpose.msra.mxu0 %v2300_v27  ;;  %v2376_v27 = vld [vmem:[%s2837_s18 + $0xac] ss:$16 sps:$4 sm:$0xff]  }
 0x1a4   : > { %1500 = vmatprep.subr.bf16.mxu0 %v2301_v50  ;;  %v2374_v50 = vld [vmem:[%s2837_s18 + $0xa8] ss:$16 sps:$4 sm:$0xff]  }
 0x1ab   : > { %1501 = vmatpush1.bf16.xpose.msra.mxu0 %v2303_v52  ;;  %v2379_v52 = vld [vmem:[%s2837_s18 + $0xcc] ss:$16 sps:$4 sm:$0xff]  }
 0x1ac   : > { %1502 = vmatprep.subr.bf16.mxu0 %v2304_v13  ;;  %v2377_v13 = vld [vmem:[%s2837_s18 + $0xc8] ss:$16 sps:$4 sm:$0xff]  }
 0x1b3   : > { %1503 = vmatpush1.bf16.xpose.msra.mxu0 %v2306_v39  ;;  %v2382_v39 = vld [vmem:[%s2837_s18 + $0xec] ss:$16 sps:$4 sm:$0xff]  }
 0x1b4   : > { %1528 = vmatprep.subr.bf16.mxu0 %v2311_v19  ;;  %v2380_v19 = vld [vmem:[%s2837_s18 + $0xe8] ss:$16 sps:$4 sm:$0xff]   ;;  %s1877_s18 = sshll.u32 %s2846_s14, 4  ;;  %s3275_s18 = int_to_ptr.vmem [resolvable:$true] %s1877_s18 }
 0x1b5   : > { %s2447_s11 = scalar_lea.vmem %s3275_s18, 512  ;;  %p2454_p12 = scmp.lt.s32.totalorder %s3275_s18, %s2452_s9 }
 0x1b6   : > { %p2448_p9 = scmp.ne.s32.totalorder %s3275_s18, %s2447_s11  ;;  %p2455_p2 = scmp.lt.s32.totalorder %s2453_s13, %s2447_s11 }
 0x1b8   : > { %p2449_p10 = pnand %p2448_p9, %p3384_p1  ;;  %p2456_p13 = por %p2455_p2, %p2454_p12 }
 0x1ba   : > { %1521 = vmatmul.mubr.bf16.vlgmr.msra.gmra.mrb[0].mxu0 %v2047_v43  ;;  %v1576_v43 = vld [vmem:[%s2846_s14 + $0x8] sm:$0xff]  ;;  %p2450_p11 = pneg %p2449_p10 }
 0x1bb   : > { %1529 = vmatpush1.bf16.xpose.msra.mxu0 %v2309_v11  ;;  %1560 = vmatprep.mubr.bf16.mxu0 %v2050_v25 }
 0x1bc   : > { %1530 = vmatprep.subr.bf16.mxu0 %v2314_v55  ;;  %p2457_p0 = pnand %p2456_p13, %p2450_p11 }
 0x1c3   : > { %1531 = vmatpush1.bf16.xpose.msra.mxu0 %v2312_v59 }
 0x1c4   : > { %1532 = vmatprep.subr.bf16.mxu0 %v2317_v4 }
 0x1cb   : > { %1533 = vmatpush1.bf16.xpose.msra.mxu0 %v2315_v62 }
 0x1cc   : > { %1534 = vmatprep.subr.bf16.mxu0 %v2320_v0  ;;  %v1577_v0 = vld [vmem:[%s2846_s14 + $0x10] sm:$0xff] }
 0x1d3   : > { %1535 = vmatpush1.bf16.xpose.msra.mxu0 %v2318_v42  ;;  %v1578_v42 = vld [vmem:[%s2846_s14 + $0x18] sm:$0xff] }
 0x1d4   : > { %1536 = vmatprep.subr.bf16.mxu0 %v2323_v2 }
 0x1db   : > { %1537 = vmatpush1.bf16.xpose.msra.mxu0 %v2321_v15 }
 0x1dc   : > { %1538 = vmatprep.subr.bf16.mxu0 %v2326_v56 }
 0x1e3   : > { %1539 = vmatpush1.bf16.xpose.msra.mxu0 %v2324_v63 }
 0x1e4   : > { %1540 = vmatprep.subr.bf16.mxu0 %v2329_v5 }
 0x1eb   : > { %1541 = vmatpush1.bf16.xpose.msra.mxu0 %v2327_v40 }
 0x1ec   : > { %1542 = vmatprep.subr.bf16.mxu0 %v2332_v47 }
 0x1f3   : > { %1543 = vmatpush1.bf16.xpose.msra.mxu0 %v2330_v6 }
 0x1fa   : > { %1561 = vmatmul.mubr.bf16.vlgmr.msra.gmra.mrb[0].mxu0 %v2049_v8 }
 0x2cd   : > { %v1562_v29 = vpop.f32.mrb[0].mxu0 }
 0x2ce   : > { %v2128_v30 = vadd.f32 %v2046_v17, %v1562_v29  ;;  %v1564_v20 = vpop.f32.mrb[1].mxu0 }
 0x2cf   : > { %v1565_v21 = vpop.f32.mrb[2].mxu0 }
 0x2d0   : > { %v2083_v26 = vmul.f32 -1.442695, %v2128_v30  ;;  %v1566_v38 = vpop.f32.mrb[3].mxu0 }
 0x2d2   : > { %2383 = vpow2.f32 %v2083_v26 }
 0x2dc   : > { %v2384_v1 = vpop.eup %2383 }
 0x2dd   : > { %v1571_v14 = vadd.f32 1.0, %v2384_v1 }
 0x2df   : > { %2385 = vrcp.f32 %v1571_v14 }
 0x2e9   : > { %v2386_v61 = vpop.eup %2385 }
 0x2ea   : > { %v1574_v31 = vmul.f32 %v2386_v61, %v2128_v30 }
 0x2ec   : > { %v1579_v32 = vpack.c.bf16 %v1574_v31, %v1574_v31 }
 0x2ee   : > { %1805 = vmatmul.mubr.bf16.vlgmr.msra.gmra.mrb[0].mxu1 %v1579_v32 }
 0x2ef   : > { %1814 = vmatpush1.bf16.msra.mxu1 %v2359_v23  ;;  %1845 = vmatprep.mubr.bf16.mxu1 %v2586_v60 }
 0x2f0   : > { %1815 = vmatprep.subr.bf16.mxu1 %v2364_v34 }
 0x2f3   : > { %1816 = vmatpush1.bf16.msra.mxu1 %v2362_v33 }
 0x2f4   : > { %1817 = vmatprep.subr.bf16.mxu1 %v2367_v37 }
 0x2f7   : > { %1818 = vmatpush1.bf16.msra.mxu1 %v2365_v12 }
 0x2f8   : > { %1819 = vmatprep.subr.bf16.mxu1 %v2370_v44 }
 0x2fb   : > { %1820 = vmatpush1.bf16.msra.mxu1 %v2368_v45 }
 0x2fc   : > { %1821 = vmatprep.subr.bf16.mxu1 %v2373_v48 }
 0x2ff   : > { %1822 = vmatpush1.bf16.msra.mxu1 %v2371_v35 }
 0x300   : > { %1823 = vmatprep.subr.bf16.mxu1 %v2376_v27 }
 0x303   : > { %1824 = vmatpush1.bf16.msra.mxu1 %v2374_v50 }
 0x304   : > { %1825 = vmatprep.subr.bf16.mxu1 %v2379_v52 }
 0x307   : > { %1826 = vmatpush1.bf16.msra.mxu1 %v2377_v13 }
 0x308   : > { %1827 = vmatprep.subr.bf16.mxu1 %v2382_v39 }
 0x30b   : > { %1828 = vmatpush1.bf16.msra.mxu1 %v2380_v19 }
 0x30e   : > { %1846 = vmatmul.mubr.bf16.vlgmr.msra.gmra.mrb[4].mxu1 %v1579_v32 }
 0x3c1   : > { %v1806_v11 = vpop.f32.mrb[0].mxu1 }
 0x3c2   : > { %v1854_v25 = vadd.f32 %v1806_v11, %v1575_v36  ;;  %v1808_v55 = vpop.f32.mrb[1].mxu1 }
 0x3c3   : > { %v1855_v59 = vadd.f32 %v1808_v55, %v1576_v43  ;;  %v1810_v4 = vpop.f32.mrb[2].mxu1 }
 0x3c4   : > { %1858 = vst [vmem:[%s2846_s14] sm:$0xff] %v1854_v25  ;;  %v1811_v62 = vpop.f32.mrb[3].mxu1 }
 0x3c5   : > { %1859 = vst [vmem:[%s2846_s14 + $0x8] sm:$0xff] %v1855_v59 }
 0x3e1   : > { %v1847_v2 = vpop.f32.mrb[4].mxu1 }
 0x3e2   : > { %v1856_v15 = vadd.f32 %v1847_v2, %v1577_v0  ;;  %v1849_v56 = vpop.f32.mrb[5].mxu1 }
 0x3e3   : > { %v1857_v63 = vadd.f32 %v1849_v56, %v1578_v42  ;;  %v1851_v5 = vpop.f32.mrb[6].mxu1 }
 0x3e4   : > { %1860 = vst [vmem:[%s2846_s14 + $0x10] sm:$0xff] %v1856_v15  ;;  %v1852_v40 = vpop.f32.mrb[7].mxu1 }
 0x3e5   : > { %1861 = vst [vmem:[%s2846_s14 + $0x18] sm:$0xff] %v1857_v63 }
 0x3e6   : > { %2460 = shalt.err (!%p2457_p0)
}
 0x3e7   : > { %s2461_s2 = scalar_lea.hbm %s3273_s16, 512  ;;  %s2465_s24 = scalar_lea.hbm %s3383_s15, 1024 }
 0x3e8   : > { %p2462_p4 = scmp.ne.s32.totalorder %s3273_s16, %s2461_s2  ;;  %p2466_p7 = scmp.lt.u32.totalorder %s3273_s16, %s3383_s15 }
 0x3e9   : > { %p2467_p3 = scmp.lt.u32.totalorder %s2465_s24, %s2461_s2  ;;  %p2469_p9 = scmp.lt.u32.totalorder %s2461_s2, %s3273_s16 }
 0x3ea   : > { %p2463_p8 = pnand %p2462_p4, %p3384_p1 }
 0x3eb   : > { %p2468_p6 = por %p2467_p3, %p2466_p7 }
 0x3ec   : > { %p2464_p5 = pneg %p2463_p8 }
 0x3ed   : > { %p2470_p10 = por %p2469_p9, %p2468_p6 }
 0x3ef   : > { %p2471_p11 = pnand %p2470_p10, %p2464_p5 }
 0x3f1   : > { %2474 = shalt.err (!%p2471_p11)
}
 0x3f2   : > { %2153 = dma.vmem_to_hbm [thread:$0]  (%p3384_p1), %s3275_s18, 512, %s3273_s16, %s1863_s28  }
 0x3f3 PF: > { %p2167_p12 = scmp.ge.s32.totalorder %s2573_s7, 2  ;;  %s1889_s8 = sand.u32 1, %s2533_s21  }
 0x3f4   : > { %p3385_p2 = scmp.ne.s32.totalorder %s3369_s19, 0  ;;  %s1890_s10 = scalar_lea.sflag [#allocation5], %s1889_s8 }
 0x3f6   : > { %p2163_p13 = pnand %p2167_p12, %p3385_p2 }
 0x3f8   : > { %2528 = dma.done.wait (!%p2163_p13), %s1890_s10, 512  }
 0x3f9   : > { %2530 = vsyncadd (!%p2163_p13), %s1890_s10, 4294966784  ;;  %s25_s7 = sadd.s32 1, %s2573_s7   ;;  %s3386_s29 = sld [smem:[#allocation17_spill]] }
 0x3fa   : > { %p22_p0 = scmp.ge.s32.totalorder %s25_s7, 6   ;;  %s3387_s27 = sld [smem:[#allocation12_spill]] }
 0x3fb   : > { %s3388_s26 = sld [smem:[#allocation18_spill]]  ;;  %s3389_s18 = sld [smem:[#allocation13_spill]] }
 0x3fc   : > { %s3390_s28 = sld [smem:[#allocation14_spill]]  ;;  %s3391_s12 = sld [smem:[#allocation15_spill]] }
 0x3fd   : > { %s3392_s30 = sld [smem:[#allocation16_spill]]  ;;  %s3393_s21 = smov %s2537_s22 }
 0x3fe   : > { %s3394_s22 = smov %s2541_s23  ;;  %s3396_s24 = smov %s2549_s25 }
 0x3ff   : > { %s3395_s23 = smov %s3386_s29  ;;  %24 = sbr.rel (!%p22_p0) target bundleno = 14 (0xe), region = 107 }
 0x400   : > { %s3397_s25 = smov %s3387_s27 }
 0x401   : > { %s3398_s27 = smov %s3389_s18 }
 0x402   : > { %s3399_s29 = smov %s3391_s12 }
 0x406   :  { %1895 = vsyncpa [#allocation4], 1 }
 0x407   :  { %1897 = vsyncpa [#allocation4 + $0x1], 1 }
 0x408   :  { %1898 = vsyncpa [#allocation7], 1 }
 0x409   :  { %1900 = vsyncpa [#allocation7 + $0x1], 1 }
 0x40a   :  { %1901 = vsyncpa [#allocation5], 1 }
 0x40b   :  { %1903 = vsyncpa [#allocation5 + $0x1], 1 }

</bundles_post_ra>
